<compile_context>
chip_gen: v7x
topology: tpu7x:2x2x1
jax: 0.10.0
libtpu: 0.0.40
codegen_flags: <defaults>
</compile_context>

<pallas_src>
import functools

import jax
import jax.numpy as jnp
from jax import lax
from jax.experimental import pallas as pl
from jax.experimental.pallas import tpu as pltpu


def _round_up(n, m):
    return ((n + m - 1) // m) * m


def _ceil_div(a, b):
    return (a + b - 1) // b


def _choose_time_chunk(T, Bblk, I, Hp, Op, budget_bytes, cap=32):
    """Largest time chunk whose VMEM working set fits in budget_bytes."""
    lane = lambda n: _round_up(n, 128)
    # Tc-independent VMEM: single-buffered full-array weights + states + out.
    fixed = (_round_up(I, 16) * 4 * Hp * 2      # W_ih^T   bf16
             + Hp * 4 * Hp * 2                  # W_hh^T   bf16
             + 8 * 4 * Hp * 4                   # bias     f32 (sublane padded)
             + Hp * lane(Op) * 2                # W_fc^T   bf16
             + 8 * lane(Op) * 4                 # b_fc     f32
             + 2 * Bblk * Hp * 4                # h, c     f32
             + 2 * Bblk * lane(Op) * 4)         # out blk  f32 (double buffered)
    # Per-timestep VMEM: double-buffered bf16 x tile + bf16 xp scratch row-band.
    per_t = Bblk * (2 * lane(I) * 2 + 4 * Hp * 2)
    tc = (budget_bytes - fixed) // per_t
    return max(1, min(int(tc), T, cap))


def lstm_fc_kernel(x_ref, wih_ref, whh_ref, b_ref, wfc_ref, bfc_ref,
                   out_ref, h_scr, c_scr, xp_scr, *, seq_len, time_chunk):
    """Grid = (batch_block, time_chunk). One step runs Tc recurrence steps.

    x_ref   : (Tc*Bblk, I)   bf16 flat time-major input chunk (no reshape)
    wih_ref : (I, 4Hp)       bf16 W_ih^T   (full array, resident in VMEM)
    whh_ref : (Hp, 4Hp)      bf16 W_hh^T   (full array, resident in VMEM)
    b_ref   : (1, 4Hp)       f32  b_ih+b_hh
    wfc_ref : (Hp, Op)       bf16 W_fc^T
    bfc_ref : (1, Op)        f32  b_fc
    out_ref : (Bblk, Op)     f32  FC output block (written on last time chunk)
    h_scr, c_scr : (Bblk, Hp) f32 LSTM state, persists across the time axis
    xp_scr  : (Tc*Bblk, 4Hp) bf16 hoisted input projection for this chunk
    """
    t_idx = pl.program_id(1)

    @pl.when(t_idx == 0)
    def _():
        h_scr[...] = jnp.zeros_like(h_scr)
        c_scr[...] = jnp.zeros_like(c_scr)

    Bblk, Hp = h_scr.shape

    # Hoisted input projection: one big (Tc*Bblk, I) @ (I, 4Hp) MXU matmul per
    # chunk. Bias is added in f32, then the result is rounded to bf16 scratch.
    xp = jnp.dot(x_ref[...], wih_ref[...],
                 preferred_element_type=jnp.float32) + b_ref[...]
    xp_scr[...] = xp.astype(jnp.bfloat16)

    # Hoist loop-invariant loads out of the recurrence.
    whh = whh_ref[...]                       # (Hp, 4Hp) bf16
    h0 = h_scr[...]
    c0 = c_scr[...]
    masked_tail = (seq_len % time_chunk) != 0

    def step(t, carry):
        h, c = carry
        row = pl.multiple_of(t * Bblk, Bblk)
        x_t = xp_scr[pl.ds(row, Bblk), :].astype(jnp.float32)   # (Bblk, 4Hp)
        # TODO(synk): on v5e, pltpu.matmul_push_rhs / matmul_acc_lhs could keep
        # whh resident in the MXU across the unrolled steps; on v7x the MRB
        # could accumulate x_t in place instead of this separate VPU add.
        gates = x_t + jnp.dot(h.astype(jnp.bfloat16), whh,
                              preferred_element_type=jnp.float32)
        # Lane-aligned gate slices (Hp is a multiple of 128), PyTorch i,f,g,o.
        i_g = jax.nn.sigmoid(gates[:, 0 * Hp:1 * Hp])
        f_g = jax.nn.sigmoid(gates[:, 1 * Hp:2 * Hp])
        g_g = jnp.tanh(gates[:, 2 * Hp:3 * Hp])
        o_g = jax.nn.sigmoid(gates[:, 3 * Hp:4 * Hp])
        c_new = f_g * c + i_g * g_g
        h_new = o_g * jnp.tanh(c_new)
        if masked_tail:
            # Tail timesteps beyond the true sequence length must not update
            # state (zero-padded inputs would still move h/c otherwise).
            valid = (t_idx * time_chunk + t) < seq_len
            h_new = jnp.where(valid, h_new, h)
            c_new = jnp.where(valid, c_new, c)
        return (h_new, c_new)

    h_f, c_f = lax.fori_loop(0, time_chunk, step, (h0, c0), unroll=True)

    h_scr[...] = h_f
    c_scr[...] = c_f

    @pl.when(t_idx == pl.num_programs(1) - 1)
    def _():
        # fc(out[:, -1, :]) == h_T @ W_fc^T + b_fc   (lane-dense padded store)
        out_ref[...] = (jnp.dot(h_f.astype(jnp.bfloat16), wfc_ref[...],
                                preferred_element_type=jnp.float32)
                        + bfc_ref[...])


def lstm_model_forward(x, params):
    """Equivalent of LSTMModel.forward. x: (B, T, I) batch-first, float32."""
    B, T, I = x.shape
    H = params["w_hh"].shape[1]
    O = params["w_fc"].shape[0]

    # TODO(synk): the v6e review note about packing all four gates into a
    # single 128-lane block (for H<=32) via pltpu.roll is not applied; per-gate
    # 128 padding is kept since it is the right layout for realistic H>=128.
    Hp = max(128, _round_up(H, 128))   # lane-aligned per-gate hidden width
    Op = max(128, _round_up(O, 128))   # lane-dense FC output store

    # Batch blocking: pad to a multiple of 16 (bf16 sublane packing keeps the
    # per-step xp_scr row slices tile-aligned). Split into two blocks on a
    # "parallel" grid axis when the batch is big enough for both v7x cores.
    n_b = 2 if B > 16 else 1
    Bblk = _round_up(_ceil_div(B, n_b), 16)
    Bp = n_b * Bblk

    # VMEM-budget-derived time chunk (conservative 24 MiB working-set budget,
    # safe for v5e/v6e/v7x scoped VMEM limits).
    Tc = _choose_time_chunk(T, Bblk, I, Hp, Op, budget_bytes=24 * 1024 * 1024)
    n_t = _ceil_div(T, Tc)
    T_pad = n_t * Tc

    # --- per-gate repack + zero-pad weights so gate slices are lane-aligned --
    def pack_gates(w):                 # w: (4H, K) -> (K, 4Hp), PyTorch i,f,g,o
        K = w.shape[1]
        w4 = w.reshape(4, H, K)
        wp = jnp.zeros((4, Hp, K), w.dtype).at[:, :H, :].set(w4)
        return wp.reshape(4 * Hp, K).T

    wih_t = pack_gates(params["w_ih"]).astype(jnp.bfloat16)            # (I, 4Hp)
    whh_t = (jnp.zeros((Hp, 4 * Hp), jnp.float32)
             .at[:H, :].set(pack_gates(params["w_hh"]))
             .astype(jnp.bfloat16))                                     # (Hp, 4Hp)

    b4 = (params["b_ih"] + params["b_hh"]).reshape(4, H)
    b_pad = (jnp.zeros((4, Hp), jnp.float32).at[:, :H].set(b4)
             .reshape(1, 4 * Hp))                                       # (1, 4Hp)

    wfc_t = (jnp.zeros((Hp, Op), jnp.float32)
             .at[:H, :O].set(params["w_fc"].T)
             .astype(jnp.bfloat16))                                     # (Hp, Op)
    bfc = jnp.zeros((1, Op), jnp.float32).at[0, :O].set(params["b_fc"])

    # --- flatten x to (n_b*n_t*Tc*Bblk, I) in HBM so each grid step's x tile
    # is a plain rectangular 2-D block (no in-kernel reshape). Zero time
    # padding is only read by masked-out tail steps.
    x_tm = jnp.transpose(x, (1, 0, 2)).astype(jnp.float32)              # (T,B,I)
    x_pad = jnp.zeros((T_pad, Bp, I), jnp.float32).at[:T, :B, :].set(x_tm)
    x2d = (x_pad.reshape(n_t, Tc, n_b, Bblk, I)
           .transpose(2, 0, 1, 3, 4)
           .reshape(n_b * n_t * Tc * Bblk, I)
           .astype(jnp.bfloat16))

    kernel = functools.partial(lstm_fc_kernel, seq_len=T, time_chunk=Tc)

    # Loop-invariant operands: full array resident in VMEM, single-buffered.
    resident_spec = pl.BlockSpec(memory_space=pltpu.MemorySpace.VMEM)

    out_p = pl.pallas_call(
        kernel,
        out_shape=jax.ShapeDtypeStruct((Bp, Op), jnp.float32),
        grid_spec=pltpu.PrefetchScalarGridSpec(
            num_scalar_prefetch=0,
            grid=(n_b, n_t),
            in_specs=[
                pl.BlockSpec((Tc * Bblk, I), lambda b, t: (b * n_t + t, 0)),
                resident_spec,   # W_ih^T
                resident_spec,   # W_hh^T
                resident_spec,   # bias
                resident_spec,   # W_fc^T
                resident_spec,   # b_fc
            ],
            out_specs=pl.BlockSpec((Bblk, Op), lambda b, t: (b, 0)),
            scratch_shapes=[
                pltpu.VMEM((Bblk, Hp), jnp.float32),              # h state
                pltpu.VMEM((Bblk, Hp), jnp.float32),              # c state
                pltpu.VMEM((Tc * Bblk, 4 * Hp), jnp.bfloat16),    # x projection
            ],
        ),
        compiler_params=pltpu.CompilerParams(
            dimension_semantics=("parallel", "arbitrary"),
            vmem_limit_bytes=32 * 1024 * 1024,
        ),
    )(x2d, wih_t, whh_t, b_pad, wfc_t, bfc)

    return out_p[:B, :O]


def lstm_model_ref(x, params):
    """Pure-JAX f32 reference (matches PyTorch nn.LSTM + nn.Linear semantics)."""
    B, T, I = x.shape
    H = params["w_hh"].shape[1]

    def step(carry, x_t):
        h, c = carry
        gates = (x_t @ params["w_ih"].T + h @ params["w_hh"].T
                 + params["b_ih"] + params["b_hh"])
        i = jax.nn.sigmoid(gates[:, 0 * H:1 * H])
        f = jax.nn.sigmoid(gates[:, 1 * H:2 * H])
        g = jnp.tanh(gates[:, 2 * H:3 * H])
        o = jax.nn.sigmoid(gates[:, 3 * H:4 * H])
        c = f * c + i * g
        h = o * jnp.tanh(c)
        return (h, c), None

    h0 = jnp.zeros((B, H), jnp.float32)
    c0 = jnp.zeros((B, H), jnp.float32)
    (h_T, _), _ = lax.scan(step, (h0, c0), jnp.transpose(x, (1, 0, 2)))
    return h_T @ params["w_fc"].T + params["b_fc"]


def init_params(key, input_size, hidden_size, output_size):
    # Deterministic synthetic init (PyTorch-style U(-1/sqrt(H), 1/sqrt(H))).
    k = 1.0 / jnp.sqrt(jnp.float32(hidden_size))
    keys = jax.random.split(key, 6)
    u = lambda kk, shape: jax.random.uniform(kk, shape, jnp.float32, -k, k)
    return {
        "w_ih": u(keys[0], (4 * hidden_size, input_size)),
        "w_hh": u(keys[1], (4 * hidden_size, hidden_size)),
        "b_ih": u(keys[2], (4 * hidden_size,)),
        "b_hh": u(keys[3], (4 * hidden_size,)),
        "w_fc": u(keys[4], (output_size, hidden_size)),
        "b_fc": u(keys[5], (output_size,)),
    }


if __name__ == "__main__":
    # TODO(synk): num_layers > 1 would stack LSTM layers; this matches the
    # module's default num_layers=1 forward pass.
    B, T, I, H, O = 2, 8, 16, 32, 4

    key = jax.random.PRNGKey(0)
    k_x, k_p = jax.random.split(key)
    x = jax.random.normal(k_x, (B, T, I), jnp.float32)
    params = init_params(k_p, I, H, O)

    out = jax.block_until_ready(jax.jit(lstm_model_forward)(x, params))
    ref = jax.block_until_ready(lstm_model_ref(x, params))

    assert out.shape == (B, O)
    err = jnp.max(jnp.abs(out - ref))
    # bf16 MXU inputs + bf16 xp scratch (f32 accumulation) -> loosened tolerance.
    assert jnp.allclose(out, ref, atol=2e-2, rtol=2e-2), f"max abs err {err}"
    print("KERNEL_OK")
</pallas_src>

<mosaic_0001>
module attributes {stable_mosaic.version = 11 : i64} {
  func.func @lstm_fc_kernel(%arg0: i32, %arg1: i32, %arg2: memref<128x16xbf16, #tpu.memory_space<vmem>>, %arg3: memref<16x512xbf16, #tpu.memory_space<vmem>>, %arg4: memref<128x512xbf16, #tpu.memory_space<vmem>>, %arg5: memref<1x512xf32, #tpu.memory_space<vmem>>, %arg6: memref<128x128xbf16, #tpu.memory_space<vmem>>, %arg7: memref<1x128xf32, #tpu.memory_space<vmem>>, %arg8: memref<16x128xf32, #tpu.memory_space<vmem>>, %arg9: memref<16x128xf32, #tpu.memory_space<vmem>>, %arg10: memref<16x128xf32, #tpu.memory_space<vmem>>, %arg11: memref<128x512xbf16, #tpu.memory_space<vmem>>) attributes {dimension_semantics = [#tpu.dimension_semantics<parallel>, #tpu.dimension_semantics<arbitrary>], iteration_bounds = array<i64: 1, 1>, scalar_prefetch = 0 : i64, scratch_operands = 3 : i64, tpu.core_type = #tpu.core_type<tc>, window_params = [{transform_indices = @transform_0, window_bounds = array<i64: 128, 16>}, {pipeline_mode = #tpu.pipeline_mode<synchronous>, transform_indices = @transform_1, window_bounds = array<i64: 16, 512>}, {pipeline_mode = #tpu.pipeline_mode<synchronous>, transform_indices = @transform_2, window_bounds = array<i64: 128, 512>}, {pipeline_mode = #tpu.pipeline_mode<synchronous>, transform_indices = @transform_3, window_bounds = array<i64: 1, 512>}, {pipeline_mode = #tpu.pipeline_mode<synchronous>, transform_indices = @transform_4, window_bounds = array<i64: 128, 128>}, {pipeline_mode = #tpu.pipeline_mode<synchronous>, transform_indices = @transform_5, window_bounds = array<i64: 1, 128>}, {transform_indices = @transform_6, window_bounds = array<i64: 16, 128>}]} {
    %c0_i32 = arith.constant 0 : i32
    %0 = arith.cmpi eq, %arg1, %c0_i32 : i32
    %1 = arith.extui %0 : i1 to i32
    %c0_i32_0 = arith.constant 0 : i32
    %2 = arith.cmpi ne, %1, %c0_i32_0 : i32
    scf.if %2 {
      %cst_68 = arith.constant 0.000000e+00 : f32
      %283 = vector.broadcast %cst_68 : f32 to vector<16x128xf32>
      %c0_69 = arith.constant 0 : index
      %c0_70 = arith.constant 0 : index
      %284 = vector.load %arg9[%c0_69, %c0_70] : memref<16x128xf32, #tpu.memory_space<vmem>>, vector<16x128xf32>
      tpu.vector_store %arg9[%c0_69, %c0_70], %283 {strides = array<i32>} : memref<16x128xf32, #tpu.memory_space<vmem>>, vector<16x128xf32>,
      %cst_71 = arith.constant 0.000000e+00 : f32
      %285 = vector.broadcast %cst_71 : f32 to vector<16x128xf32>
      %c0_72 = arith.constant 0 : index
      %c0_73 = arith.constant 0 : index
      %286 = vector.load %arg10[%c0_72, %c0_73] : memref<16x128xf32, #tpu.memory_space<vmem>>, vector<16x128xf32>
      tpu.vector_store %arg10[%c0_72, %c0_73], %285 {strides = array<i32>} : memref<16x128xf32, #tpu.memory_space<vmem>>, vector<16x128xf32>,
    } else {
    }
    %c0 = arith.constant 0 : index
    %c0_1 = arith.constant 0 : index
    %3 = vector.load %arg2[%c0, %c0_1] : memref<128x16xbf16, #tpu.memory_space<vmem>>, vector<128x16xbf16>
    %c0_2 = arith.constant 0 : index
    %c0_3 = arith.constant 0 : index
    %4 = vector.load %arg3[%c0_2, %c0_3] : memref<16x512xbf16, #tpu.memory_space<vmem>>, vector<16x512xbf16>
    %cst = arith.constant dense<0.000000e+00> : vector<128x512xf32>
    %5 = tpu.matmul %3, %4, %cst {dimension_numbers = #tpu.dot_dimension_numbers<[1], [0], [0], [1], [0, 0, 1, 1], [], []>} : vector<128x16xbf16>, vector<16x512xbf16>, vector<128x512xf32> -> vector<128x512xf32>
    %c0_4 = arith.constant 0 : index
    %c0_5 = arith.constant 0 : index
    %6 = vector.load %arg5[%c0_4, %c0_5] : memref<1x512xf32, #tpu.memory_space<vmem>>, vector<1x512xf32>
    %7 = vector.broadcast %6 : vector<1x512xf32> to vector<128x512xf32>
    %8 = arith.addf %5, %7 : vector<128x512xf32>
    %9 = arith.truncf %8 : vector<128x512xf32> to vector<128x512xbf16>
    %c0_6 = arith.constant 0 : index
    %c0_7 = arith.constant 0 : index
    %10 = vector.load %arg11[%c0_6, %c0_7] : memref<128x512xbf16, #tpu.memory_space<vmem>>, vector<128x512xbf16>
    tpu.vector_store %arg11[%c0_6, %c0_7], %9 {strides = array<i32>} : memref<128x512xbf16, #tpu.memory_space<vmem>>, vector<128x512xbf16>,
    %c0_8 = arith.constant 0 : index
    %c0_9 = arith.constant 0 : index
    %11 = vector.load %arg4[%c0_8, %c0_9] : memref<128x512xbf16, #tpu.memory_space<vmem>>, vector<128x512xbf16>
    %c0_10 = arith.constant 0 : index
    %c0_11 = arith.constant 0 : index
    %12 = vector.load %arg9[%c0_10, %c0_11] : memref<16x128xf32, #tpu.memory_space<vmem>>, vector<16x128xf32>
    %c0_12 = arith.constant 0 : index
    %c0_13 = arith.constant 0 : index
    %13 = vector.load %arg10[%c0_12, %c0_13] : memref<16x128xf32, #tpu.memory_space<vmem>>, vector<16x128xf32>
    %c0_i32_14 = arith.constant 0 : i32
    %c16_i32 = arith.constant 16 : i32
    %14 = arith.muli %c0_i32_14, %c16_i32 : i32
    %15 = tpu.assume_multiple %14, 16 : i32
    %16 = arith.index_cast %15 : i32 to index
    %c0_15 = arith.constant 0 : index
    %17 = vector.load %arg11[%16, %c0_15] : memref<128x512xbf16, #tpu.memory_space<vmem>>, vector<16x512xbf16>
    %18 = arith.extf %17 : vector<16x512xbf16> to vector<16x512xf32>
    %19 = arith.truncf %12 : vector<16x128xf32> to vector<16x128xbf16>
    %cst_16 = arith.constant dense<0.000000e+00> : vector<16x512xf32>
    %20 = tpu.matmul %19, %11, %cst_16 {dimension_numbers = #tpu.dot_dimension_numbers<[1], [0], [0], [1], [0, 0, 1, 1], [], []>} : vector<16x128xbf16>, vector<128x512xbf16>, vector<16x512xf32> -> vector<16x512xf32>
    %21 = arith.addf %18, %20 : vector<16x512xf32>
    %22 = vector.extract_strided_slice %21 {offsets = [0, 0], sizes = [16, 128], strides = [1, 1]} : vector<16x512xf32> to vector<16x128xf32>
    %23 = arith.negf %22 : vector<16x128xf32>
    %24 = math.exp %23 : vector<16x128xf32>
    %cst_17 = arith.constant 1.000000e+00 : f32
    %25 = vector.broadcast %cst_17 : f32 to vector<16x128xf32>
    %26 = arith.addf %25, %24 : vector<16x128xf32>
    %27 = arith.divf %25, %26 : vector<16x128xf32>
    %28 = vector.extract_strided_slice %21 {offsets = [0, 128], sizes = [16, 128], strides = [1, 1]} : vector<16x512xf32> to vector<16x128xf32>
    %29 = arith.negf %28 : vector<16x128xf32>
    %30 = math.exp %29 : vector<16x128xf32>
    %cst_18 = arith.constant 1.000000e+00 : f32
    %31 = vector.broadcast %cst_18 : f32 to vector<16x128xf32>
    %32 = arith.addf %31, %30 : vector<16x128xf32>
    %33 = arith.divf %31, %32 : vector<16x128xf32>
    %34 = vector.extract_strided_slice %21 {offsets = [0, 256], sizes = [16, 128], strides = [1, 1]} : vector<16x512xf32> to vector<16x128xf32>
    %35 = math.tanh %34 : vector<16x128xf32>
    %36 = vector.extract_strided_slice %21 {offsets = [0, 384], sizes = [16, 128], strides = [1, 1]} : vector<16x512xf32> to vector<16x128xf32>
    %37 = arith.negf %36 : vector<16x128xf32>
    %38 = math.exp %37 : vector<16x128xf32>
    %cst_19 = arith.constant 1.000000e+00 : f32
    %39 = vector.broadcast %cst_19 : f32 to vector<16x128xf32>
    %40 = arith.addf %39, %38 : vector<16x128xf32>
    %41 = arith.divf %39, %40 : vector<16x128xf32>
    %42 = arith.mulf %33, %13 : vector<16x128xf32>
    %43 = arith.mulf %27, %35 : vector<16x128xf32>
    %44 = arith.addf %42, %43 : vector<16x128xf32>
    %45 = math.tanh %44 : vector<16x128xf32>
    %46 = arith.mulf %41, %45 : vector<16x128xf32>
    %c1_i32 = arith.constant 1 : i32
    %c16_i32_20 = arith.constant 16 : i32
    %47 = arith.muli %c1_i32, %c16_i32_20 : i32
    %48 = tpu.assume_multiple %47, 16 : i32
    %49 = arith.index_cast %48 : i32 to index
    %c0_21 = arith.constant 0 : index
    %50 = vector.load %arg11[%49, %c0_21] : memref<128x512xbf16, #tpu.memory_space<vmem>>, vector<16x512xbf16>
    %51 = arith.extf %50 : vector<16x512xbf16> to vector<16x512xf32>
    %52 = arith.truncf %46 : vector<16x128xf32> to vector<16x128xbf16>
    %cst_22 = arith.constant dense<0.000000e+00> : vector<16x512xf32>
    %53 = tpu.matmul %52, %11, %cst_22 {dimension_numbers = #tpu.dot_dimension_numbers<[1], [0], [0], [1], [0, 0, 1, 1], [], []>} : vector<16x128xbf16>, vector<128x512xbf16>, vector<16x512xf32> -> vector<16x512xf32>
    %54 = arith.addf %51, %53 : vector<16x512xf32>
    %55 = vector.extract_strided_slice %54 {offsets = [0, 0], sizes = [16, 128], strides = [1, 1]} : vector<16x512xf32> to vector<16x128xf32>
    %56 = arith.negf %55 : vector<16x128xf32>
    %57 = math.exp %56 : vector<16x128xf32>
    %cst_23 = arith.constant 1.000000e+00 : f32
    %58 = vector.broadcast %cst_23 : f32 to vector<16x128xf32>
    %59 = arith.addf %58, %57 : vector<16x128xf32>
    %60 = arith.divf %58, %59 : vector<16x128xf32>
    %61 = vector.extract_strided_slice %54 {offsets = [0, 128], sizes = [16, 128], strides = [1, 1]} : vector<16x512xf32> to vector<16x128xf32>
    %62 = arith.negf %61 : vector<16x128xf32>
    %63 = math.exp %62 : vector<16x128xf32>
    %cst_24 = arith.constant 1.000000e+00 : f32
    %64 = vector.broadcast %cst_24 : f32 to vector<16x128xf32>
    %65 = arith.addf %64, %63 : vector<16x128xf32>
    %66 = arith.divf %64, %65 : vector<16x128xf32>
    %67 = vector.extract_strided_slice %54 {offsets = [0, 256], sizes = [16, 128], strides = [1, 1]} : vector<16x512xf32> to vector<16x128xf32>
    %68 = math.tanh %67 : vector<16x128xf32>
    %69 = vector.extract_strided_slice %54 {offsets = [0, 384], sizes = [16, 128], strides = [1, 1]} : vector<16x512xf32> to vector<16x128xf32>
    %70 = arith.negf %69 : vector<16x128xf32>
    %71 = math.exp %70 : vector<16x128xf32>
    %cst_25 = arith.constant 1.000000e+00 : f32
    %72 = vector.broadcast %cst_25 : f32 to vector<16x128xf32>
    %73 = arith.addf %72, %71 : vector<16x128xf32>
    %74 = arith.divf %72, %73 : vector<16x128xf32>
    %75 = arith.mulf %66, %44 : vector<16x128xf32>
    %76 = arith.mulf %60, %68 : vector<16x128xf32>
    %77 = arith.addf %75, %76 : vector<16x128xf32>
    %78 = math.tanh %77 : vector<16x128xf32>
    %79 = arith.mulf %74, %78 : vector<16x128xf32>
    %c2_i32 = arith.constant 2 : i32
    %c16_i32_26 = arith.constant 16 : i32
    %80 = arith.muli %c2_i32, %c16_i32_26 : i32
    %81 = tpu.assume_multiple %80, 16 : i32
    %82 = arith.index_cast %81 : i32 to index
    %c0_27 = arith.constant 0 : index
    %83 = vector.load %arg11[%82, %c0_27] : memref<128x512xbf16, #tpu.memory_space<vmem>>, vector<16x512xbf16>
    %84 = arith.extf %83 : vector<16x512xbf16> to vector<16x512xf32>
    %85 = arith.truncf %79 : vector<16x128xf32> to vector<16x128xbf16>
    %cst_28 = arith.constant dense<0.000000e+00> : vector<16x512xf32>
    %86 = tpu.matmul %85, %11, %cst_28 {dimension_numbers = #tpu.dot_dimension_numbers<[1], [0], [0], [1], [0, 0, 1, 1], [], []>} : vector<16x128xbf16>, vector<128x512xbf16>, vector<16x512xf32> -> vector<16x512xf32>
    %87 = arith.addf %84, %86 : vector<16x512xf32>
    %88 = vector.extract_strided_slice %87 {offsets = [0, 0], sizes = [16, 128], strides = [1, 1]} : vector<16x512xf32> to vector<16x128xf32>
    %89 = arith.negf %88 : vector<16x128xf32>
    %90 = math.exp %89 : vector<16x128xf32>
    %cst_29 = arith.constant 1.000000e+00 : f32
    %91 = vector.broadcast %cst_29 : f32 to vector<16x128xf32>
    %92 = arith.addf %91, %90 : vector<16x128xf32>
    %93 = arith.divf %91, %92 : vector<16x128xf32>
    %94 = vector.extract_strided_slice %87 {offsets = [0, 128], sizes = [16, 128], strides = [1, 1]} : vector<16x512xf32> to vector<16x128xf32>
    %95 = arith.negf %94 : vector<16x128xf32>
    %96 = math.exp %95 : vector<16x128xf32>
    %cst_30 = arith.constant 1.000000e+00 : f32
    %97 = vector.broadcast %cst_30 : f32 to vector<16x128xf32>
    %98 = arith.addf %97, %96 : vector<16x128xf32>
    %99 = arith.divf %97, %98 : vector<16x128xf32>
    %100 = vector.extract_strided_slice %87 {offsets = [0, 256], sizes = [16, 128], strides = [1, 1]} : vector<16x512xf32> to vector<16x128xf32>
    %101 = math.tanh %100 : vector<16x128xf32>
    %102 = vector.extract_strided_slice %87 {offsets = [0, 384], sizes = [16, 128], strides = [1, 1]} : vector<16x512xf32> to vector<16x128xf32>
    %103 = arith.negf %102 : vector<16x128xf32>
    %104 = math.exp %103 : vector<16x128xf32>
    %cst_31 = arith.constant 1.000000e+00 : f32
    %105 = vector.broadcast %cst_31 : f32 to vector<16x128xf32>
    %106 = arith.addf %105, %104 : vector<16x128xf32>
    %107 = arith.divf %105, %106 : vector<16x128xf32>
    %108 = arith.mulf %99, %77 : vector<16x128xf32>
    %109 = arith.mulf %93, %101 : vector<16x128xf32>
    %110 = arith.addf %108, %109 : vector<16x128xf32>
    %111 = math.tanh %110 : vector<16x128xf32>
    %112 = arith.mulf %107, %111 : vector<16x128xf32>
    %c3_i32 = arith.constant 3 : i32
    %c16_i32_32 = arith.constant 16 : i32
    %113 = arith.muli %c3_i32, %c16_i32_32 : i32
    %114 = tpu.assume_multiple %113, 16 : i32
    %115 = arith.index_cast %114 : i32 to index
    %c0_33 = arith.constant 0 : index
    %116 = vector.load %arg11[%115, %c0_33] : memref<128x512xbf16, #tpu.memory_space<vmem>>, vector<16x512xbf16>
    %117 = arith.extf %116 : vector<16x512xbf16> to vector<16x512xf32>
    %118 = arith.truncf %112 : vector<16x128xf32> to vector<16x128xbf16>
    %cst_34 = arith.constant dense<0.000000e+00> : vector<16x512xf32>
    %119 = tpu.matmul %118, %11, %cst_34 {dimension_numbers = #tpu.dot_dimension_numbers<[1], [0], [0], [1], [0, 0, 1, 1], [], []>} : vector<16x128xbf16>, vector<128x512xbf16>, vector<16x512xf32> -> vector<16x512xf32>
    %120 = arith.addf %117, %119 : vector<16x512xf32>
    %121 = vector.extract_strided_slice %120 {offsets = [0, 0], sizes = [16, 128], strides = [1, 1]} : vector<16x512xf32> to vector<16x128xf32>
    %122 = arith.negf %121 : vector<16x128xf32>
    %123 = math.exp %122 : vector<16x128xf32>
    %cst_35 = arith.constant 1.000000e+00 : f32
    %124 = vector.broadcast %cst_35 : f32 to vector<16x128xf32>
    %125 = arith.addf %124, %123 : vector<16x128xf32>
    %126 = arith.divf %124, %125 : vector<16x128xf32>
    %127 = vector.extract_strided_slice %120 {offsets = [0, 128], sizes = [16, 128], strides = [1, 1]} : vector<16x512xf32> to vector<16x128xf32>
    %128 = arith.negf %127 : vector<16x128xf32>
    %129 = math.exp %128 : vector<16x128xf32>
    %cst_36 = arith.constant 1.000000e+00 : f32
    %130 = vector.broadcast %cst_36 : f32 to vector<16x128xf32>
    %131 = arith.addf %130, %129 : vector<16x128xf32>
    %132 = arith.divf %130, %131 : vector<16x128xf32>
    %133 = vector.extract_strided_slice %120 {offsets = [0, 256], sizes = [16, 128], strides = [1, 1]} : vector<16x512xf32> to vector<16x128xf32>
    %134 = math.tanh %133 : vector<16x128xf32>
    %135 = vector.extract_strided_slice %120 {offsets = [0, 384], sizes = [16, 128], strides = [1, 1]} : vector<16x512xf32> to vector<16x128xf32>
    %136 = arith.negf %135 : vector<16x128xf32>
    %137 = math.exp %136 : vector<16x128xf32>
    %cst_37 = arith.constant 1.000000e+00 : f32
    %138 = vector.broadcast %cst_37 : f32 to vector<16x128xf32>
    %139 = arith.addf %138, %137 : vector<16x128xf32>
    %140 = arith.divf %138, %139 : vector<16x128xf32>
    %141 = arith.mulf %132, %110 : vector<16x128xf32>
    %142 = arith.mulf %126, %134 : vector<16x128xf32>
    %143 = arith.addf %141, %142 : vector<16x128xf32>
    %144 = math.tanh %143 : vector<16x128xf32>
    %145 = arith.mulf %140, %144 : vector<16x128xf32>
    %c4_i32 = arith.constant 4 : i32
    %c16_i32_38 = arith.constant 16 : i32
    %146 = arith.muli %c4_i32, %c16_i32_38 : i32
    %147 = tpu.assume_multiple %146, 16 : i32
    %148 = arith.index_cast %147 : i32 to index
    %c0_39 = arith.constant 0 : index
    %149 = vector.load %arg11[%148, %c0_39] : memref<128x512xbf16, #tpu.memory_space<vmem>>, vector<16x512xbf16>
    %150 = arith.extf %149 : vector<16x512xbf16> to vector<16x512xf32>
    %151 = arith.truncf %145 : vector<16x128xf32> to vector<16x128xbf16>
    %cst_40 = arith.constant dense<0.000000e+00> : vector<16x512xf32>
    %152 = tpu.matmul %151, %11, %cst_40 {dimension_numbers = #tpu.dot_dimension_numbers<[1], [0], [0], [1], [0, 0, 1, 1], [], []>} : vector<16x128xbf16>, vector<128x512xbf16>, vector<16x512xf32> -> vector<16x512xf32>
    %153 = arith.addf %150, %152 : vector<16x512xf32>
    %154 = vector.extract_strided_slice %153 {offsets = [0, 0], sizes = [16, 128], strides = [1, 1]} : vector<16x512xf32> to vector<16x128xf32>
    %155 = arith.negf %154 : vector<16x128xf32>
    %156 = math.exp %155 : vector<16x128xf32>
    %cst_41 = arith.constant 1.000000e+00 : f32
    %157 = vector.broadcast %cst_41 : f32 to vector<16x128xf32>
    %158 = arith.addf %157, %156 : vector<16x128xf32>
    %159 = arith.divf %157, %158 : vector<16x128xf32>
    %160 = vector.extract_strided_slice %153 {offsets = [0, 128], sizes = [16, 128], strides = [1, 1]} : vector<16x512xf32> to vector<16x128xf32>
    %161 = arith.negf %160 : vector<16x128xf32>
    %162 = math.exp %161 : vector<16x128xf32>
    %cst_42 = arith.constant 1.000000e+00 : f32
    %163 = vector.broadcast %cst_42 : f32 to vector<16x128xf32>
    %164 = arith.addf %163, %162 : vector<16x128xf32>
    %165 = arith.divf %163, %164 : vector<16x128xf32>
    %166 = vector.extract_strided_slice %153 {offsets = [0, 256], sizes = [16, 128], strides = [1, 1]} : vector<16x512xf32> to vector<16x128xf32>
    %167 = math.tanh %166 : vector<16x128xf32>
    %168 = vector.extract_strided_slice %153 {offsets = [0, 384], sizes = [16, 128], strides = [1, 1]} : vector<16x512xf32> to vector<16x128xf32>
    %169 = arith.negf %168 : vector<16x128xf32>
    %170 = math.exp %169 : vector<16x128xf32>
    %cst_43 = arith.constant 1.000000e+00 : f32
    %171 = vector.broadcast %cst_43 : f32 to vector<16x128xf32>
    %172 = arith.addf %171, %170 : vector<16x128xf32>
    %173 = arith.divf %171, %172 : vector<16x128xf32>
    %174 = arith.mulf %165, %143 : vector<16x128xf32>
    %175 = arith.mulf %159, %167 : vector<16x128xf32>
    %176 = arith.addf %174, %175 : vector<16x128xf32>
    %177 = math.tanh %176 : vector<16x128xf32>
    %178 = arith.mulf %173, %177 : vector<16x128xf32>
    %c5_i32 = arith.constant 5 : i32
    %c16_i32_44 = arith.constant 16 : i32
    %179 = arith.muli %c5_i32, %c16_i32_44 : i32
    %180 = tpu.assume_multiple %179, 16 : i32
    %181 = arith.index_cast %180 : i32 to index
    %c0_45 = arith.constant 0 : index
    %182 = vector.load %arg11[%181, %c0_45] : memref<128x512xbf16, #tpu.memory_space<vmem>>, vector<16x512xbf16>
    %183 = arith.extf %182 : vector<16x512xbf16> to vector<16x512xf32>
    %184 = arith.truncf %178 : vector<16x128xf32> to vector<16x128xbf16>
    %cst_46 = arith.constant dense<0.000000e+00> : vector<16x512xf32>
    %185 = tpu.matmul %184, %11, %cst_46 {dimension_numbers = #tpu.dot_dimension_numbers<[1], [0], [0], [1], [0, 0, 1, 1], [], []>} : vector<16x128xbf16>, vector<128x512xbf16>, vector<16x512xf32> -> vector<16x512xf32>
    %186 = arith.addf %183, %185 : vector<16x512xf32>
    %187 = vector.extract_strided_slice %186 {offsets = [0, 0], sizes = [16, 128], strides = [1, 1]} : vector<16x512xf32> to vector<16x128xf32>
    %188 = arith.negf %187 : vector<16x128xf32>
    %189 = math.exp %188 : vector<16x128xf32>
    %cst_47 = arith.constant 1.000000e+00 : f32
    %190 = vector.broadcast %cst_47 : f32 to vector<16x128xf32>
    %191 = arith.addf %190, %189 : vector<16x128xf32>
    %192 = arith.divf %190, %191 : vector<16x128xf32>
    %193 = vector.extract_strided_slice %186 {offsets = [0, 128], sizes = [16, 128], strides = [1, 1]} : vector<16x512xf32> to vector<16x128xf32>
    %194 = arith.negf %193 : vector<16x128xf32>
    %195 = math.exp %194 : vector<16x128xf32>
    %cst_48 = arith.constant 1.000000e+00 : f32
    %196 = vector.broadcast %cst_48 : f32 to vector<16x128xf32>
    %197 = arith.addf %196, %195 : vector<16x128xf32>
    %198 = arith.divf %196, %197 : vector<16x128xf32>
    %199 = vector.extract_strided_slice %186 {offsets = [0, 256], sizes = [16, 128], strides = [1, 1]} : vector<16x512xf32> to vector<16x128xf32>
    %200 = math.tanh %199 : vector<16x128xf32>
    %201 = vector.extract_strided_slice %186 {offsets = [0, 384], sizes = [16, 128], strides = [1, 1]} : vector<16x512xf32> to vector<16x128xf32>
    %202 = arith.negf %201 : vector<16x128xf32>
    %203 = math.exp %202 : vector<16x128xf32>
    %cst_49 = arith.constant 1.000000e+00 : f32
    %204 = vector.broadcast %cst_49 : f32 to vector<16x128xf32>
    %205 = arith.addf %204, %203 : vector<16x128xf32>
    %206 = arith.divf %204, %205 : vector<16x128xf32>
    %207 = arith.mulf %198, %176 : vector<16x128xf32>
    %208 = arith.mulf %192, %200 : vector<16x128xf32>
    %209 = arith.addf %207, %208 : vector<16x128xf32>
    %210 = math.tanh %209 : vector<16x128xf32>
    %211 = arith.mulf %206, %210 : vector<16x128xf32>
    %c6_i32 = arith.constant 6 : i32
    %c16_i32_50 = arith.constant 16 : i32
    %212 = arith.muli %c6_i32, %c16_i32_50 : i32
    %213 = tpu.assume_multiple %212, 16 : i32
    %214 = arith.index_cast %213 : i32 to index
    %c0_51 = arith.constant 0 : index
    %215 = vector.load %arg11[%214, %c0_51] : memref<128x512xbf16, #tpu.memory_space<vmem>>, vector<16x512xbf16>
    %216 = arith.extf %215 : vector<16x512xbf16> to vector<16x512xf32>
    %217 = arith.truncf %211 : vector<16x128xf32> to vector<16x128xbf16>
    %cst_52 = arith.constant dense<0.000000e+00> : vector<16x512xf32>
    %218 = tpu.matmul %217, %11, %cst_52 {dimension_numbers = #tpu.dot_dimension_numbers<[1], [0], [0], [1], [0, 0, 1, 1], [], []>} : vector<16x128xbf16>, vector<128x512xbf16>, vector<16x512xf32> -> vector<16x512xf32>
    %219 = arith.addf %216, %218 : vector<16x512xf32>
    %220 = vector.extract_strided_slice %219 {offsets = [0, 0], sizes = [16, 128], strides = [1, 1]} : vector<16x512xf32> to vector<16x128xf32>
    %221 = arith.negf %220 : vector<16x128xf32>
    %222 = math.exp %221 : vector<16x128xf32>
    %cst_53 = arith.constant 1.000000e+00 : f32
    %223 = vector.broadcast %cst_53 : f32 to vector<16x128xf32>
    %224 = arith.addf %223, %222 : vector<16x128xf32>
    %225 = arith.divf %223, %224 : vector<16x128xf32>
    %226 = vector.extract_strided_slice %219 {offsets = [0, 128], sizes = [16, 128], strides = [1, 1]} : vector<16x512xf32> to vector<16x128xf32>
    %227 = arith.negf %226 : vector<16x128xf32>
    %228 = math.exp %227 : vector<16x128xf32>
    %cst_54 = arith.constant 1.000000e+00 : f32
    %229 = vector.broadcast %cst_54 : f32 to vector<16x128xf32>
    %230 = arith.addf %229, %228 : vector<16x128xf32>
    %231 = arith.divf %229, %230 : vector<16x128xf32>
    %232 = vector.extract_strided_slice %219 {offsets = [0, 256], sizes = [16, 128], strides = [1, 1]} : vector<16x512xf32> to vector<16x128xf32>
    %233 = math.tanh %232 : vector<16x128xf32>
    %234 = vector.extract_strided_slice %219 {offsets = [0, 384], sizes = [16, 128], strides = [1, 1]} : vector<16x512xf32> to vector<16x128xf32>
    %235 = arith.negf %234 : vector<16x128xf32>
    %236 = math.exp %235 : vector<16x128xf32>
    %cst_55 = arith.constant 1.000000e+00 : f32
    %237 = vector.broadcast %cst_55 : f32 to vector<16x128xf32>
    %238 = arith.addf %237, %236 : vector<16x128xf32>
    %239 = arith.divf %237, %238 : vector<16x128xf32>
    %240 = arith.mulf %231, %209 : vector<16x128xf32>
    %241 = arith.mulf %225, %233 : vector<16x128xf32>
    %242 = arith.addf %240, %241 : vector<16x128xf32>
    %243 = math.tanh %242 : vector<16x128xf32>
    %244 = arith.mulf %239, %243 : vector<16x128xf32>
    %c7_i32 = arith.constant 7 : i32
    %c16_i32_56 = arith.constant 16 : i32
    %245 = arith.muli %c7_i32, %c16_i32_56 : i32
    %246 = tpu.assume_multiple %245, 16 : i32
    %247 = arith.index_cast %246 : i32 to index
    %c0_57 = arith.constant 0 : index
    %248 = vector.load %arg11[%247, %c0_57] : memref<128x512xbf16, #tpu.memory_space<vmem>>, vector<16x512xbf16>
    %249 = arith.extf %248 : vector<16x512xbf16> to vector<16x512xf32>
    %250 = arith.truncf %244 : vector<16x128xf32> to vector<16x128xbf16>
    %cst_58 = arith.constant dense<0.000000e+00> : vector<16x512xf32>
    %251 = tpu.matmul %250, %11, %cst_58 {dimension_numbers = #tpu.dot_dimension_numbers<[1], [0], [0], [1], [0, 0, 1, 1], [], []>} : vector<16x128xbf16>, vector<128x512xbf16>, vector<16x512xf32> -> vector<16x512xf32>
    %252 = arith.addf %249, %251 : vector<16x512xf32>
    %253 = vector.extract_strided_slice %252 {offsets = [0, 0], sizes = [16, 128], strides = [1, 1]} : vector<16x512xf32> to vector<16x128xf32>
    %254 = arith.negf %253 : vector<16x128xf32>
    %255 = math.exp %254 : vector<16x128xf32>
    %cst_59 = arith.constant 1.000000e+00 : f32
    %256 = vector.broadcast %cst_59 : f32 to vector<16x128xf32>
    %257 = arith.addf %256, %255 : vector<16x128xf32>
    %258 = arith.divf %256, %257 : vector<16x128xf32>
    %259 = vector.extract_strided_slice %252 {offsets = [0, 128], sizes = [16, 128], strides = [1, 1]} : vector<16x512xf32> to vector<16x128xf32>
    %260 = arith.negf %259 : vector<16x128xf32>
    %261 = math.exp %260 : vector<16x128xf32>
    %cst_60 = arith.constant 1.000000e+00 : f32
    %262 = vector.broadcast %cst_60 : f32 to vector<16x128xf32>
    %263 = arith.addf %262, %261 : vector<16x128xf32>
    %264 = arith.divf %262, %263 : vector<16x128xf32>
    %265 = vector.extract_strided_slice %252 {offsets = [0, 256], sizes = [16, 128], strides = [1, 1]} : vector<16x512xf32> to vector<16x128xf32>
    %266 = math.tanh %265 : vector<16x128xf32>
    %267 = vector.extract_strided_slice %252 {offsets = [0, 384], sizes = [16, 128], strides = [1, 1]} : vector<16x512xf32> to vector<16x128xf32>
    %268 = arith.negf %267 : vector<16x128xf32>
    %269 = math.exp %268 : vector<16x128xf32>
    %cst_61 = arith.constant 1.000000e+00 : f32
    %270 = vector.broadcast %cst_61 : f32 to vector<16x128xf32>
    %271 = arith.addf %270, %269 : vector<16x128xf32>
    %272 = arith.divf %270, %271 : vector<16x128xf32>
    %273 = arith.mulf %264, %242 : vector<16x128xf32>
    %274 = arith.mulf %258, %266 : vector<16x128xf32>
    %275 = arith.addf %273, %274 : vector<16x128xf32>
    %276 = math.tanh %275 : vector<16x128xf32>
    %277 = arith.mulf %272, %276 : vector<16x128xf32>
    %c8_i32 = arith.constant 8 : i32
    %c0_62 = arith.constant 0 : index
    %c0_63 = arith.constant 0 : index
    %278 = vector.load %arg9[%c0_62, %c0_63] : memref<16x128xf32, #tpu.memory_space<vmem>>, vector<16x128xf32>
    tpu.vector_store %arg9[%c0_62, %c0_63], %277 {strides = array<i32>} : memref<16x128xf32, #tpu.memory_space<vmem>>, vector<16x128xf32>,
    %c0_64 = arith.constant 0 : index
    %c0_65 = arith.constant 0 : index
    %279 = vector.load %arg10[%c0_64, %c0_65] : memref<16x128xf32, #tpu.memory_space<vmem>>, vector<16x128xf32>
    tpu.vector_store %arg10[%c0_64, %c0_65], %275 {strides = array<i32>} : memref<16x128xf32, #tpu.memory_space<vmem>>, vector<16x128xf32>,
    %c0_i32_66 = arith.constant 0 : i32
    %280 = arith.cmpi eq, %arg1, %c0_i32_66 : i32
    %281 = arith.extui %280 : i1 to i32
    %c0_i32_67 = arith.constant 0 : i32
    %282 = arith.cmpi ne, %281, %c0_i32_67 : i32
    scf.if %282 {
      %283 = arith.truncf %277 : vector<16x128xf32> to vector<16x128xbf16>
      %c0_68 = arith.constant 0 : index
      %c0_69 = arith.constant 0 : index
      %284 = vector.load %arg6[%c0_68, %c0_69] : memref<128x128xbf16, #tpu.memory_space<vmem>>, vector<128x128xbf16>
      %cst_70 = arith.constant dense<0.000000e+00> : vector<16x128xf32>
      %285 = tpu.matmul %283, %284, %cst_70 {dimension_numbers = #tpu.dot_dimension_numbers<[1], [0], [0], [1], [0, 0, 1, 1], [], []>} : vector<16x128xbf16>, vector<128x128xbf16>, vector<16x128xf32> -> vector<16x128xf32>
      %c0_71 = arith.constant 0 : index
      %c0_72 = arith.constant 0 : index
      %286 = vector.load %arg7[%c0_71, %c0_72] : memref<1x128xf32, #tpu.memory_space<vmem>>, vector<1x128xf32>
      %287 = vector.broadcast %286 : vector<1x128xf32> to vector<16x128xf32>
      %288 = arith.addf %285, %287 : vector<16x128xf32>
      %c0_73 = arith.constant 0 : index
      %c0_74 = arith.constant 0 : index
      %289 = vector.load %arg8[%c0_73, %c0_74] : memref<16x128xf32, #tpu.memory_space<vmem>>, vector<16x128xf32>
      tpu.vector_store %arg8[%c0_73, %c0_74], %288 {strides = array<i32>} : memref<16x128xf32, #tpu.memory_space<vmem>>, vector<16x128xf32>,
    } else {
    }
    return
  }
  func.func @transform_0(%arg0: i32, %arg1: i32) -> (i32, i32) {
    %c1_i32 = arith.constant 1 : i32
    %0 = arith.muli %arg0, %c1_i32 : i32
    %1 = arith.addi %0, %arg1 : i32
    %c0_i32 = arith.constant 0 : i32
    %c0_i32_0 = arith.constant 0 : i32
    return %1, %c0_i32 : i32, i32
  }
  func.func @transform_1(%arg0: i32, %arg1: i32) -> (i32, i32) {
    %c0_i32 = arith.constant 0 : i32
    %c0_i32_0 = arith.constant 0 : i32
    %c0_i32_1 = arith.constant 0 : i32
    return %c0_i32, %c0_i32_0 : i32, i32
  }
  func.func @transform_2(%arg0: i32, %arg1: i32) -> (i32, i32) {
    %c0_i32 = arith.constant 0 : i32
    %c0_i32_0 = arith.constant 0 : i32
    %c0_i32_1 = arith.constant 0 : i32
    return %c0_i32, %c0_i32_0 : i32, i32
  }
  func.func @transform_3(%arg0: i32, %arg1: i32) -> (i32, i32) {
    %c0_i32 = arith.constant 0 : i32
    %c0_i32_0 = arith.constant 0 : i32
    %c0_i32_1 = arith.constant 0 : i32
    return %c0_i32, %c0_i32_0 : i32, i32
  }
  func.func @transform_4(%arg0: i32, %arg1: i32) -> (i32, i32) {
    %c0_i32 = arith.constant 0 : i32
    %c0_i32_0 = arith.constant 0 : i32
    %c0_i32_1 = arith.constant 0 : i32
    return %c0_i32, %c0_i32_0 : i32, i32
  }
  func.func @transform_5(%arg0: i32, %arg1: i32) -> (i32, i32) {
    %c0_i32 = arith.constant 0 : i32
    %c0_i32_0 = arith.constant 0 : i32
    %c0_i32_1 = arith.constant 0 : i32
    return %c0_i32, %c0_i32_0 : i32, i32
  }
  func.func @transform_6(%arg0: i32, %arg1: i32) -> (i32, i32) {
    %c0_i32 = arith.constant 0 : i32
    %c0_i32_0 = arith.constant 0 : i32
    return %arg0, %c0_i32 : i32, i32
  }
}

</mosaic_0001>

<bundles_post_ra>
// kernel: lstm_model_forward.1
= control target key start
LH: loop header
LB: loop body
LE: loop exit
PB: predicated region body
PF: predicated region fallthrough
CT: control target
= control target key end

     0   :  { %v3586_v1 = vmov 0   ;;  %vm156_vm0 = vcmask 130048   ;;  %v2581_v45 = vmov 0.0|0.0   ;;  %v76_v46 = vlaneseq  ;;  %s3579_s1 = inlined_call_operand.vmem [shape: bf16[16,512], index: 1, kind: input, shape index: {}]   ;;  %s3580_s0 = inlined_call_operand.vmem [shape: bf16[128,16], index: 0, kind: input, shape index: {}]   ;;  %s3581_s2 = inlined_call_operand.vmem [shape: bf16[128,512], index: 2, kind: input, shape index: {}]   ;;  %s3582_s3 = inlined_call_operand.vmem [shape: f32[1,512], index: 3, kind: input, shape index: {}]   ;;  %s3583_s4 = inlined_call_operand.vmem [shape: bf16[128,128], index: 4, kind: input, shape index: {}]   ;;  %s3584_s5 = inlined_call_operand.vmem [shape: f32[1,128], index: 5, kind: input, shape index: {}]   ;;  %s3585_s6 = inlined_call_operand.vmem [shape: f32[16,128], index: 6, kind: output, shape index: {}]  }
   0x1   :  { %v2222_v0 = vld [vmem:[%s3579_s1 + $0x4] ss:$16 sps:$4 sm:$0xff]   ;;  %213 = vmatprep.mubr.bf16.mxu0 %v3586_v1  ;;  %273 = vmatprep.mubr.bf16.mxu1 %v3586_v1  ;;  %v2224_v2 = vld [vmem:[%s3579_s1] ss:$16 sps:$4 sm:$0xff]   ;;  %v2227_v5 = vld [vmem:[%s3579_s1 + $0x8] ss:$16 sps:$4 sm:$0xff]  }
   0x2   :  { %181 = vmatprep.subr.bf16.mxu0 %v2222_v0  ;;  %2216 = vmatprep.subr.bf16.mxu1 %v2222_v0  ;;  %v2225_v3 = vld [vmem:[%s3580_s0] sm:$0xff]   ;;  %v2633_v4 = vld [vmem:[%s3580_s0 + $0x30] sm:$0xff]   ;;  %v2229_v6 = vld [vmem:[%s3579_s1 + $0xc] ss:$16 sps:$4 sm:$0xff]   ;;  %v77_v47 = vshrl.u32 %v76_v46, 7  ;;  %vm2583_vm1 = vmmov 0  }
   0x3   :  { %182 = vmatpush1.bf16.msra.mxu0 %v2224_v2  ;;  %2217 = vmatpush1.bf16.msra.mxu1 %v2224_v2  ;;  %v2230_v7 = vld [vmem:[%s3580_s0 + $0x8] sm:$0xff]   ;;  %v2652_v8 = vld [vmem:[%s3581_s2 + $0x4] ss:$16 sps:$4 sm:$0xff]   ;;  %v2662_v10 = vld [vmem:[%s3581_s2] ss:$16 sps:$4 sm:$0xff]  }
   0x4   :  { %294 = vmatprep.subr.bf16.mxu1 %v2229_v6  ;;  %v2657_v9 = vld [vmem:[%s3581_s2 + $0xc] ss:$16 sps:$4 sm:$0xff]   ;;  %683 = vmatprep.subr.bf16.mxu0 %v2652_v8  ;;  %v2675_v12 = vld [vmem:[%s3581_s2 + $0x24] ss:$16 sps:$4 sm:$0xff]   ;;  %v2680_v13 = vld [vmem:[%s3581_s2 + $0x20] ss:$16 sps:$4 sm:$0xff]  }
   0x5   :  { %v2667_v11 = vld [vmem:[%s3580_s0 + $0x38] sm:$0xff]   ;;  %v2686_v14 = vld [vmem:[%s3581_s2 + $0x44] ss:$16 sps:$4 sm:$0xff]   ;;  %v2697_v15 = vld [vmem:[%s3581_s2 + $0x40] ss:$16 sps:$4 sm:$0xff]   ;;  %v78_v48 = vsub.s32 0, %v77_v47 }
   0x6   :  { %2082 = vmatmul.mubr.msk.bf16.vlgmr.msra.gmra.mrb[0].mxu0 %vm156_vm0, %v2225_v3  ;;  %2088 = vmatmul.mubr.msk.bf16.vlgmr.msra.gmra.mrb[0].mxu1 %vm156_vm0, %v2633_v4  ;;  %v2703_v16 = vld [vmem:[%s3581_s2 + $0x64] ss:$16 sps:$4 sm:$0xff]   ;;  %v2711_v18 = vld [vmem:[%s3581_s2 + $0x8] ss:$16 sps:$4 sm:$0xff]   ;;  %v2716_v19 = vld [vmem:[%s3581_s2 + $0x2c] ss:$16 sps:$4 sm:$0xff]  }
   0x7   :  { %223 = vmatprep.mubr.bf16.mxu0 %v3586_v1  ;;  %295 = vmatpush1.bf16.msra.mxu1 %v2227_v5  ;;  %v2232_v17 = vld [vmem:[%s3580_s0 + $0x10] sm:$0xff]   ;;  %v2737_v22 = vld [vmem:[%s3581_s2 + $0x28] ss:$16 sps:$4 sm:$0xff]   ;;  %v2744_v23 = vld [vmem:[%s3581_s2 + $0x4c] ss:$16 sps:$4 sm:$0xff]   ;;  %v82_v50 = vsub.s32 1, %v77_v47 }
   0x8   :  { %283 = vmatprep.mubr.bf16.mxu1 %v3586_v1  ;;  %726 = vmatprep.subr.bf16.mxu1 %v2657_v9  ;;  %v2723_v20 = vld [vmem:[%s3581_s2 + $0x60] ss:$16 sps:$4 sm:$0xff]   ;;  %v2730_v21 = vld [vmem:[%s3581_s2 + $0x84] ss:$16 sps:$4 sm:$0xff]   ;;  %v2242_v25 = vld [vmem:[%s3580_s0 + $0x18] sm:$0xff]  }
   0x9   :  { %684 = vmatpush1.bf16.msra.mxu0 %v2662_v10  ;;  %v2750_v24 = vld [vmem:[%s3581_s2 + $0x80] ss:$16 sps:$4 sm:$0xff]   ;;  %v2760_v26 = vld [vmem:[%s3581_s2 + $0x48] ss:$16 sps:$4 sm:$0xff]   ;;  %v2765_v27 = vld [vmem:[%s3581_s2 + $0xa4] ss:$16 sps:$4 sm:$0xff]  }
   0xa   :  { %685 = vmatprep.subr.bf16.mxu0 %v2675_v12  ;;  %v2771_v28 = vld [vmem:[%s3581_s2 + $0xa0] ss:$16 sps:$4 sm:$0xff]   ;;  %v2777_v29 = vld [vmem:[%s3581_s2 + $0x6c] ss:$16 sps:$4 sm:$0xff]   ;;  %v2784_v30 = vld [vmem:[%s3581_s2 + $0xc4] ss:$16 sps:$4 sm:$0xff]  }
   0xb   :  { %v2793_v31 = vld [vmem:[%s3581_s2 + $0x68] ss:$16 sps:$4 sm:$0xff]   ;;  %v2800_v32 = vld [vmem:[%s3581_s2 + $0xc0] ss:$16 sps:$4 sm:$0xff]   ;;  %v2805_v33 = vld [vmem:[%s3581_s2 + $0x8c] ss:$16 sps:$4 sm:$0xff]  }
   0xc   :  { %v2252_v34 = vld [vmem:[%s3580_s0 + $0x20] sm:$0xff]   ;;  %v2820_v36 = vld [vmem:[%s3581_s2 + $0x88] ss:$16 sps:$4 sm:$0xff]   ;;  %v2832_v38 = vld [vmem:[%s3581_s2 + $0xac] ss:$16 sps:$4 sm:$0xff]  }
   0xd   :  { %686 = vmatpush1.bf16.msra.mxu0 %v2680_v13  ;;  %v2815_v35 = vld [vmem:[%s3581_s2 + $0xe4] ss:$16 sps:$4 sm:$0xff]   ;;  %v2826_v37 = vld [vmem:[%s3581_s2 + $0xe0] ss:$16 sps:$4 sm:$0xff]   ;;  %v2843_v39 = vld [vmem:[%s3581_s2 + $0xa8] ss:$16 sps:$4 sm:$0xff]  }
   0xe   :  { %2083 = vmatmul.mubr.msk.bf16.gmra.mrb[4].mxu0 %vm156_vm0, %v2230_v7  ;;  %2089 = vmatmul.mubr.msk.bf16.gmra.mrb[4].mxu1 %vm156_vm0, %v2667_v11  ;;  %v2850_v40 = vld [vmem:[%s3581_s2 + $0xcc] ss:$16 sps:$4 sm:$0xff]   ;;  %v2860_v42 = vld [vmem:[%s3581_s2 + $0xc8] ss:$16 sps:$4 sm:$0xff]   ;;  %v74_v49 = vld [vmem:[%s3582_s3] sm:$0xf] }
   0xf   :  { %233 = vmatprep.mubr.bf16.mxu0 %v3586_v1  ;;  %326 = vmatprep.mubr.bf16.mxu1 %v3586_v1  ;;  %v2262_v41 = vld [vmem:[%s3580_s0 + $0x28] sm:$0xff]   ;;  %v2928_v51 = vrot.slane %v74_v49, %v78_v48  ;;  %v2930_v52 = vrot.slane %v74_v49, %v82_v50 }
  0x10   :  { %687 = vmatprep.subr.bf16.mxu0 %v2686_v14  ;;  %v2866_v43 = vld [vmem:[%s3581_s2 + $0xec] ss:$16 sps:$4 sm:$0xff]   ;;  %v2876_v44 = vld [vmem:[%s3581_s2 + $0xe8] ss:$16 sps:$4 sm:$0xff]  }
  0x11   :  { %688 = vmatpush1.bf16.msra.mxu0 %v2697_v15 }
  0x12   :  { %689 = vmatprep.subr.bf16.mxu0 %v2703_v16 }
  0x15   :  { %690 = vmatpush1.bf16.msra.mxu0 %v2723_v20 }
  0x16   :  { %2084 = vmatmul.mubr.msk.bf16.gmra.mrb[8].mxu0 %vm156_vm0, %v2232_v17  ;;  %2090 = vmatmul.mubr.msk.bf16.vlgmr.msra.gmra.mrb[8].mxu1 %vm156_vm0, %v2225_v3 }
  0x17   :  { %727 = vmatpush1.bf16.msra.mxu1 %v2711_v18  ;;  %243 = vmatprep.mubr.bf16.mxu0 %v3586_v1 }
  0x18   :  { %336 = vmatprep.mubr.bf16.mxu1 %v3586_v1  ;;  %728 = vmatprep.subr.bf16.mxu1 %v2716_v19 }
  0x19   :  { %691 = vmatprep.subr.bf16.mxu0 %v2730_v21 }
  0x1a   :  { %692 = vmatpush1.bf16.msra.mxu0 %v2750_v24 }
  0x1b   :  { %729 = vmatpush1.bf16.msra.mxu1 %v2737_v22  ;;  %693 = vmatprep.subr.bf16.mxu0 %v2765_v27 }
  0x1c   :  { %730 = vmatprep.subr.bf16.mxu1 %v2744_v23 }
  0x1e   :  { %2085 = vmatmul.mubr.msk.bf16.gmra.mrb[12].mxu0 %vm156_vm0, %v2242_v25  ;;  %2091 = vmatmul.mubr.msk.bf16.gmra.mrb[12].mxu1 %vm156_vm0, %v2230_v7 }
  0x1f   :  { %253 = vmatprep.mubr.bf16.mxu0 %v3586_v1  ;;  %346 = vmatprep.mubr.bf16.mxu1 %v3586_v1 }
  0x20   :  { %731 = vmatpush1.bf16.msra.mxu1 %v2760_v26  ;;  %694 = vmatpush1.bf16.msra.mxu0 %v2771_v28 }
  0x21   :  { %732 = vmatprep.subr.bf16.mxu1 %v2777_v29  ;;  %695 = vmatprep.subr.bf16.mxu0 %v2784_v30 }
  0x24   :  { %733 = vmatpush1.bf16.msra.mxu1 %v2793_v31  ;;  %696 = vmatpush1.bf16.msra.mxu0 %v2800_v32 }
  0x25   :  { %734 = vmatprep.subr.bf16.mxu1 %v2805_v33  ;;  %697 = vmatprep.subr.bf16.mxu0 %v2815_v35 }
  0x26   :  { %2086 = vmatmul.mubr.msk.bf16.gmra.mrb[16].mxu0 %vm156_vm0, %v2252_v34  ;;  %2092 = vmatmul.mubr.msk.bf16.gmra.mrb[16].mxu1 %vm156_vm0, %v2232_v17 }
  0x27   :  { %263 = vmatprep.mubr.bf16.mxu0 %v3586_v1  ;;  %356 = vmatprep.mubr.bf16.mxu1 %v3586_v1 }
  0x28   :  { %735 = vmatpush1.bf16.msra.mxu1 %v2820_v36  ;;  %698 = vmatpush1.bf16.msra.mxu0 %v2826_v37 }
  0x29   :  { %736 = vmatprep.subr.bf16.mxu1 %v2832_v38  ;;  %841 = vmatprep.subr.bf16.mxu0 %v2652_v8 }
  0x2c   :  { %737 = vmatpush1.bf16.msra.mxu1 %v2843_v39 }
  0x2d   :  { %738 = vmatprep.subr.bf16.mxu1 %v2850_v40 }
  0x2e   :  { %2087 = vmatmul.mubr.msk.bf16.gmra.mrb[20].mxu0 %vm156_vm0, %v2262_v41  ;;  %2093 = vmatmul.mubr.msk.bf16.gmra.mrb[20].mxu1 %vm156_vm0, %v2242_v25 }
  0x2f   :  { %366 = vmatprep.mubr.bf16.mxu1 %v3586_v1  ;;  %715 = vmatprep.mubr.bf16.mxu0 %v3586_v1 }
  0x30   :  { %739 = vmatpush1.bf16.msra.mxu1 %v2860_v42 }
  0x31   :  { %740 = vmatprep.subr.bf16.mxu1 %v2866_v43 }
  0x34   :  { %741 = vmatpush1.bf16.msra.mxu1 %v2876_v44 }
  0x35   :  { %884 = vmatprep.subr.bf16.mxu1 %v2657_v9 }
  0x36   :  { %2094 = vmatmul.mubr.msk.bf16.gmra.mrb[24].mxu1 %vm156_vm0, %v2252_v34  ;;  %716 = vmatmul.mubr.bf16.vlgmr.msra.gmra.mrb[24].mxu0 %v2581_v45 }
  0x37   :  { %376 = vmatprep.mubr.bf16.mxu1 %v3586_v1  ;;  %842 = vmatpush1.bf16.msra.mxu0 %v2662_v10 }
  0x38   :  { %843 = vmatprep.subr.bf16.mxu0 %v2675_v12  ;;  %873 = vmatprep.mubr.bf16.mxu0 %v3586_v1 }
  0x3b   :  { %844 = vmatpush1.bf16.msra.mxu0 %v2680_v13 }
  0x3c   :  { %845 = vmatprep.subr.bf16.mxu0 %v2686_v14 }
  0x3e   :  { %2095 = vmatmul.mubr.msk.bf16.gmra.mrb[28].mxu1 %vm156_vm0, %v2262_v41 }
  0x3f   :  { %386 = vmatprep.mubr.bf16.mxu1 %v3586_v1  ;;  %846 = vmatpush1.bf16.msra.mxu0 %v2697_v15 }
  0x40   :  { %847 = vmatprep.subr.bf16.mxu0 %v2703_v16 }
  0x43   :  { %848 = vmatpush1.bf16.msra.mxu0 %v2723_v20 }
  0x44   :  { %849 = vmatprep.subr.bf16.mxu0 %v2730_v21 }
  0x46   :  { %2096 = vmatmul.mubr.msk.bf16.gmra.mrb[32].mxu1 %vm156_vm0, %v2633_v4 }
  0x47   :  { %396 = vmatprep.mubr.bf16.mxu1 %v3586_v1  ;;  %850 = vmatpush1.bf16.msra.mxu0 %v2750_v24 }
  0x48   :  { %851 = vmatprep.subr.bf16.mxu0 %v2765_v27 }
  0x4b   :  { %852 = vmatpush1.bf16.msra.mxu0 %v2771_v28 }
  0x4c   :  { %853 = vmatprep.subr.bf16.mxu0 %v2784_v30 }
  0x4e   :  { %2097 = vmatmul.mubr.msk.bf16.gmra.mrb[36].mxu1 %vm156_vm0, %v2667_v11 }
  0x4f   :  { %758 = vmatprep.mubr.bf16.mxu1 %v3586_v1  ;;  %854 = vmatpush1.bf16.msra.mxu0 %v2800_v32 }
  0x50   :  { %855 = vmatprep.subr.bf16.mxu0 %v2815_v35 }
  0x53   :  { %856 = vmatpush1.bf16.msra.mxu0 %v2826_v37 }
  0x54   :  { %999 = vmatprep.subr.bf16.mxu0 %v2652_v8 }
  0x56   :  { %759 = vmatmul.mubr.bf16.vlgmr.msra.gmra.mrb[40].mxu1 %v2581_v45 }
  0x57   :  { %885 = vmatpush1.bf16.msra.mxu1 %v2711_v18  ;;  %916 = vmatprep.mubr.bf16.mxu1 %v3586_v1 }
  0x58   :  { %886 = vmatprep.subr.bf16.mxu1 %v2716_v19 }
  0x5b   :  { %887 = vmatpush1.bf16.msra.mxu1 %v2737_v22 }
  0x5c   :  { %888 = vmatprep.subr.bf16.mxu1 %v2744_v23 }
  0x5f   :  { %889 = vmatpush1.bf16.msra.mxu1 %v2760_v26 }
  0x60   :  { %890 = vmatprep.subr.bf16.mxu1 %v2777_v29 }
  0x63   :  { %891 = vmatpush1.bf16.msra.mxu1 %v2793_v31 }
  0x64   :  { %892 = vmatprep.subr.bf16.mxu1 %v2805_v33 }
  0x67   :  { %893 = vmatpush1.bf16.msra.mxu1 %v2820_v36 }
  0x68   :  { %894 = vmatprep.subr.bf16.mxu1 %v2832_v38 }
  0x6b   :  { %895 = vmatpush1.bf16.msra.mxu1 %v2843_v39 }
  0x6c   :  { %896 = vmatprep.subr.bf16.mxu1 %v2850_v40 }
  0x6f   :  { %897 = vmatpush1.bf16.msra.mxu1 %v2860_v42 }
  0x70   :  { %898 = vmatprep.subr.bf16.mxu1 %v2866_v43 }
  0x73   :  { %899 = vmatpush1.bf16.msra.mxu1 %v2876_v44 }
  0x74   :  { %1042 = vmatprep.subr.bf16.mxu1 %v2657_v9 }
  0xd9   :  { %v275_v53 = vpop.f32.mrb[0].mxu1  ;;  %v215_v54 = vpop.f32.mrb[0].mxu0 }
  0xda   :  { %v276_v55 = vadd.f32 %v275_v53, %v2928_v51  ;;  %v277_v56 = vpop.f32.mrb[1].mxu1  ;;  %v216_v57 = vadd.f32 %v215_v54, %v2928_v51  ;;  %v217_v58 = vpop.f32.mrb[1].mxu0 }
  0xdb   :  { %v278_v59 = vadd.f32 %v277_v56, %v2930_v52  ;;  %v279_v60 = vpop.f32.mrb[2].mxu1  ;;  %v218_v61 = vadd.f32 %v217_v58, %v2930_v52  ;;  %v219_v62 = vpop.f32.mrb[2].mxu0  ;;  %v86_v58 = vsub.s32 2, %v77_v47 }
  0xdc   :  { %v280_v63 = vadd.f32 %v279_v60, %v2928_v51  ;;  %v281_v0 = vpop.f32.mrb[3].mxu1  ;;  %v220_v2 = vadd.f32 %v219_v62, %v2928_v51  ;;  %v221_v3 = vpop.f32.mrb[3].mxu0  ;;  %v90_v62 = vsub.s32 3, %v77_v47 }
  0xdd   :  { %v282_v4 = vadd.f32 %v281_v0, %v2930_v52  ;;  %v222_v5 = vadd.f32 %v221_v3, %v2930_v52 }
  0xde   :  { %v2940_v6 = vpack.c.bf16 %v280_v63, %v276_v55  ;;  %v2942_v7 = vpack.c.bf16 %v220_v2, %v216_v57 }
  0xdf   :  { %v2944_v11 = vpack.c.bf16 %v282_v4, %v278_v59  ;;  %v2946_v17 = vpack.c.bf16 %v222_v5, %v218_v61  ;;  %v2964_v5 = vrot.slane %v74_v49, %v86_v58 }
  0xe0   :  { %3608 = vst [vmem:[#allocation5_spill] sm:$0xff] %v2940_v6 }
  0xe1   :  { %3609 = vst [vmem:[#allocation6_spill] sm:$0xff] %v2944_v11  ;;  %v285_v25 = vpop.f32.mrb[4].mxu1  ;;  %v225_v34 = vpop.f32.mrb[4].mxu0 }
  0xe2   :  { %v286_v41 = vadd.f32 %v285_v25, %v2928_v51  ;;  %v287_v45 = vpop.f32.mrb[5].mxu1  ;;  %v226_v46 = vadd.f32 %v225_v34, %v2928_v51  ;;  %v227_v48 = vpop.f32.mrb[5].mxu0  ;;  %v2966_v34 = vrot.slane %v74_v49, %v90_v62 }
  0xe3   :  { %v288_v50 = vadd.f32 %v287_v45, %v2930_v52  ;;  %v289_v53 = vpop.f32.mrb[6].mxu1  ;;  %v228_v54 = vadd.f32 %v227_v48, %v2930_v52  ;;  %v229_v55 = vpop.f32.mrb[6].mxu0 }
  0xe4   :  { %v290_v56 = vadd.f32 %v289_v53, %v2928_v51  ;;  %v291_v57 = vpop.f32.mrb[7].mxu1  ;;  %v230_v59 = vadd.f32 %v229_v55, %v2928_v51  ;;  %v231_v60 = vpop.f32.mrb[7].mxu0 }
  0xe5   :  { %v292_v61 = vadd.f32 %v291_v57, %v2930_v52  ;;  %v232_v63 = vadd.f32 %v231_v60, %v2930_v52 }
  0xe6   :  { %v2956_v0 = vpack.c.bf16 %v290_v56, %v286_v41  ;;  %v2958_v2 = vpack.c.bf16 %v230_v59, %v226_v46 }
  0xe7   :  { %v2960_v3 = vpack.c.bf16 %v292_v61, %v288_v50  ;;  %v2962_v4 = vpack.c.bf16 %v232_v63, %v228_v54 }
  0xe8   :  { %3610 = vst [vmem:[#allocation7_spill] sm:$0xff] %v2956_v0 }
  0xe9   :  { %3611 = vst [vmem:[#allocation8_spill] sm:$0xff] %v2960_v3  ;;  %v328_v25 = vpop.f32.mrb[8].mxu1  ;;  %v235_v45 = vpop.f32.mrb[8].mxu0 }
  0xea   :  { %v330_v48 = vpop.f32.mrb[9].mxu1  ;;  %v236_v53 = vadd.f32 %v235_v45, %v2928_v51  ;;  %v237_v47 = vpop.f32.mrb[9].mxu0  ;;  %v329_v46 = vadd.f32 %v328_v25, %v2964_v5 }
  0xeb   :  { %v332_v55 = vpop.f32.mrb[10].mxu1  ;;  %v238_v41 = vadd.f32 %v237_v47, %v2930_v52  ;;  %v239_v56 = vpop.f32.mrb[10].mxu0  ;;  %v331_v49 = vadd.f32 %v330_v48, %v2966_v34 }
  0xec   :  { %v333_v50 = vadd.f32 %v332_v55, %v2964_v5  ;;  %v334_v54 = vpop.f32.mrb[11].mxu1  ;;  %v240_v57 = vadd.f32 %v239_v56, %v2928_v51  ;;  %v241_v58 = vpop.f32.mrb[11].mxu0 }
  0xed   :  { %v335_v59 = vadd.f32 %v334_v54, %v2966_v34  ;;  %v242_v60 = vadd.f32 %v241_v58, %v2930_v52 }
  0xee   :  { %v2976_v61 = vpack.c.bf16 %v333_v50, %v329_v46  ;;  %v2978_v62 = vpack.c.bf16 %v240_v57, %v236_v53 }
  0xef   :  { %v2980_v63 = vpack.c.bf16 %v335_v59, %v331_v49  ;;  %v2982_v45 = vpack.c.bf16 %v242_v60, %v238_v41 }
  0xf0   :  { %3612 = vst [vmem:[#allocation9_spill] sm:$0xff] %v2978_v62 }
  0xf1   :  { %3613 = vst [vmem:[#allocation10_spill] sm:$0xff] %v2982_v45  ;;  %v338_v25 = vpop.f32.mrb[12].mxu1  ;;  %v245_v47 = vpop.f32.mrb[12].mxu0 }
  0xf2   :  { %v339_v55 = vadd.f32 %v338_v25, %v2964_v5  ;;  %v340_v56 = vpop.f32.mrb[13].mxu1  ;;  %v246_v1 = vadd.f32 %v245_v47, %v2928_v51  ;;  %v247_v48 = vpop.f32.mrb[13].mxu0 }
  0xf3   :  { %v341_v54 = vadd.f32 %v340_v56, %v2966_v34  ;;  %v342_v3 = vpop.f32.mrb[14].mxu1  ;;  %v248_v46 = vadd.f32 %v247_v48, %v2930_v52  ;;  %v249_v50 = vpop.f32.mrb[14].mxu0 }
  0xf4   :  { %v343_v53 = vadd.f32 %v342_v3, %v2964_v5  ;;  %v344_v57 = vpop.f32.mrb[15].mxu1  ;;  %v250_v41 = vadd.f32 %v249_v50, %v2928_v51  ;;  %v251_v58 = vpop.f32.mrb[15].mxu0 }
  0xf5   :  { %v345_v49 = vadd.f32 %v344_v57, %v2966_v34  ;;  %v252_v59 = vadd.f32 %v251_v58, %v2930_v52 }
  0xf6   :  { %v2992_v60 = vpack.c.bf16 %v343_v53, %v339_v55  ;;  %v2994_v25 = vpack.c.bf16 %v250_v41, %v246_v1 }
  0xf7   :  { %v2996_v47 = vpack.c.bf16 %v345_v49, %v341_v54  ;;  %v2998_v56 = vpack.c.bf16 %v252_v59, %v248_v46 }
  0xf8   :  { %3614 = vst [vmem:[#allocation11_spill] sm:$0xff] %v2994_v25 }
  0xf9   :  { %3615 = vst [vmem:[#allocation12_spill] sm:$0xff] %v2996_v47  ;;  %3616 = vst [vmem:[#allocation13_spill] sm:$0xff] %v2998_v56  ;;  %v348_v48 = vpop.f32.mrb[16].mxu1  ;;  %v255_v0 = vpop.f32.mrb[16].mxu0 }
  0xfa   :  { %v349_v3 = vadd.f32 %v348_v48, %v2964_v5  ;;  %v350_v11 = vpop.f32.mrb[17].mxu1  ;;  %v256_v50 = vadd.f32 %v255_v0, %v2928_v51  ;;  %v257_v6 = vpop.f32.mrb[17].mxu0 }
  0xfb   :  { %v351_v57 = vadd.f32 %v350_v11, %v2966_v34  ;;  %v352_v45 = vpop.f32.mrb[18].mxu1  ;;  %v258_v55 = vadd.f32 %v257_v6, %v2930_v52  ;;  %v259_v53 = vpop.f32.mrb[18].mxu0 }
  0xfc   :  { %v353_v1 = vadd.f32 %v352_v45, %v2964_v5  ;;  %v354_v54 = vpop.f32.mrb[19].mxu1  ;;  %v260_v46 = vadd.f32 %v259_v53, %v2928_v51  ;;  %v261_v41 = vpop.f32.mrb[19].mxu0 }
  0xfd   :  { %v355_v58 = vadd.f32 %v354_v54, %v2966_v34  ;;  %v262_v49 = vadd.f32 %v261_v41, %v2930_v52 }
  0xfe   :  { %v3008_v59 = vpack.c.bf16 %v353_v1, %v349_v3  ;;  %v3010_v0 = vpack.c.bf16 %v260_v46, %v256_v50 }
  0xff   :  { %v3012_v48 = vpack.c.bf16 %v355_v58, %v351_v57  ;;  %v3014_v11 = vpack.c.bf16 %v262_v49, %v258_v55 }
 0x100   :  { %3617 = vst [vmem:[#allocation14_spill] sm:$0xff] %v3010_v0  ;;  %v515_v0 = vunpack.c.l.bf16 %v2946_v17 }
 0x101   :  { %3618 = vst [vmem:[#allocation15_spill] sm:$0xff] %v3012_v48  ;;  %3619 = vst [vmem:[#allocation16_spill] sm:$0xff] %v3014_v11  ;;  %v358_v6 = vpop.f32.mrb[20].mxu1  ;;  %v265_v56 = vpop.f32.mrb[20].mxu0 }
 0x102   :  { %v359_v45 = vadd.f32 %v358_v6, %v2964_v5  ;;  %v360_v25 = vpop.f32.mrb[21].mxu1  ;;  %v266_v53 = vadd.f32 %v265_v56, %v2928_v51  ;;  %v267_v62 = vpop.f32.mrb[21].mxu0 }
 0x103   :  { %v361_v54 = vadd.f32 %v360_v25, %v2966_v34  ;;  %v362_v47 = vpop.f32.mrb[22].mxu1  ;;  %v268_v3 = vadd.f32 %v267_v62, %v2930_v52  ;;  %v269_v1 = vpop.f32.mrb[22].mxu0  ;;  %v514_v62 = vunpack.c.l.bf16 %v2942_v7 }
 0x104   :  { %v363_v50 = vadd.f32 %v362_v47, %v2964_v5  ;;  %v364_v57 = vpop.f32.mrb[23].mxu1  ;;  %v270_v55 = vadd.f32 %v269_v1, %v2928_v51  ;;  %v271_v46 = vpop.f32.mrb[23].mxu0 }
 0x105   :  { %v365_v41 = vadd.f32 %v364_v57, %v2966_v34  ;;  %v272_v58 = vadd.f32 %v271_v46, %v2930_v52  ;;  %v518_v52 = vunpack.c.h.bf16 %v2942_v7 }
 0x106   :  { %v3024_v49 = vpack.c.bf16 %v363_v50, %v359_v45  ;;  %v3026_v56 = vpack.c.bf16 %v270_v55, %v266_v53 }
 0x107   :  { %v3028_v6 = vpack.c.bf16 %v365_v41, %v361_v54  ;;  %v3030_v25 = vpack.c.bf16 %v272_v58, %v268_v3  ;;  %v519_v3 = vunpack.c.h.bf16 %v2946_v17 }
 0x108   :  { %3620 = vst [vmem:[#allocation17_spill] sm:$0xff] %v3026_v56 }
 0x109   :  { %3621 = vst [vmem:[#allocation18_spill] sm:$0xff] %v3028_v6  ;;  %3622 = vst [vmem:[#allocation19_spill] sm:$0xff] %v3030_v25  ;;  %v368_v11 = vpop.f32.mrb[24].mxu1  ;;  %v717_v47 = vpop.f32.mrb[24].mxu0 }
 0x10a   :  { %v369_v51 = vadd.f32 %v368_v11, %v2964_v5  ;;  %v769_v1 = vadd.f32 %v717_v47, %v514_v62  ;;  %v370_v57 = vpop.f32.mrb[25].mxu1  ;;  %v719_v48 = vpop.f32.mrb[25].mxu0 }
 0x10b   :  { %v371_v45 = vadd.f32 %v370_v57, %v2966_v34  ;;  %v770_v53 = vadd.f32 %v719_v48, %v515_v0  ;;  %v372_v54 = vpop.f32.mrb[26].mxu1  ;;  %v721_v50 = vpop.f32.mrb[26].mxu0 }
 0x10c   :  { %v373_v55 = vadd.f32 %v372_v54, %v2964_v5  ;;  %v773_v46 = vadd.f32 %v721_v50, %v518_v52  ;;  %v374_v41 = vpop.f32.mrb[27].mxu1  ;;  %v723_v58 = vpop.f32.mrb[27].mxu0  ;;  %v2130_v17 = vmul.f32 -1.442695, %v769_v1 }
 0x10d   :  { %v375_v25 = vadd.f32 %v374_v41, %v2966_v34  ;;  %v774_v11 = vadd.f32 %v723_v58, %v519_v3  ;;  %v2132_v50 = vmul.f32 -1.442695, %v770_v53 }
 0x10e   :  { %v3040_v62 = vpack.c.bf16 %v373_v55, %v369_v51  ;;  %2292 = vpow2.f32 %v2130_v17 }
 0x10f   :  { %v3042_v47 = vpack.c.bf16 %v375_v25, %v371_v45  ;;  %v2133_v41 = vmul.f32 -1.442695, %v774_v11  ;;  %v2131_v25 = vmul.f32 -1.442695, %v773_v46  ;;  %2294 = vpow2.f32 %v2132_v50 }
 0x111   :  { %v378_v7 = vpop.f32.mrb[28].mxu1  ;;  %2296 = vpow2.f32 %v2133_v41 }
 0x112   :  { %v379_v57 = vadd.f32 %v378_v7, %v2964_v5  ;;  %v380_v0 = vpop.f32.mrb[29].mxu1  ;;  %2298 = vpow2.f32 %v2131_v25 }
 0x113   :  { %v381_v48 = vadd.f32 %v380_v0, %v2966_v34  ;;  %v382_v56 = vpop.f32.mrb[30].mxu1 }
 0x114   :  { %v383_v54 = vadd.f32 %v382_v56, %v2964_v5  ;;  %v384_v52 = vpop.f32.mrb[31].mxu1 }
 0x115   :  { %v385_v6 = vadd.f32 %v384_v52, %v2966_v34 }
 0x116   :  { %v3048_v3 = vpack.c.bf16 %v383_v54, %v379_v57 }
 0x117   :  { %v3050_v51 = vpack.c.bf16 %v385_v6, %v381_v48 }
 0x118   :  { %v2293_v0 = vpop.eup %2292 }
 0x119   :  { %3623 = vst [vmem:[#allocation20_spill] sm:$0xff] %v3050_v51  ;;  %v388_v45 = vpop.f32.mrb[32].mxu1  ;;  %v2295_v54 = vpop.eup %2294 }
 0x11a   :  { %v389_v55 = vadd.f32 %v388_v45, %v2964_v5  ;;  %v390_v58 = vpop.f32.mrb[33].mxu1 }
 0x11b   :  { %v391_v1 = vadd.f32 %v390_v58, %v2966_v34  ;;  %v392_v56 = vpop.f32.mrb[34].mxu1  ;;  %v2297_v41 = vpop.eup %2296  ;;  %v783_v58 = vadd.f32 1.0, %v2293_v0  ;;  %v520_v0 = vunpack.c.h.bf16 %v2976_v61 }
 0x11c   :  { %v393_v53 = vadd.f32 %v392_v56, %v2964_v5  ;;  %v394_v7 = vpop.f32.mrb[35].mxu1 }
 0x11d   :  { %v395_v11 = vadd.f32 %v394_v7, %v2966_v34  ;;  %v796_v7 = vadd.f32 1.0, %v2297_v41  ;;  %2300 = vrcp.f32 %v783_v58 }
 0x11e   :  { %v3056_v57 = vpack.c.bf16 %v393_v53, %v389_v55  ;;  %v2299_v55 = vpop.eup %2298  ;;  %v795_v53 = vadd.f32 1.0, %v2295_v54 }
 0x11f   :  { %v3058_v6 = vpack.c.bf16 %v395_v11, %v391_v1 }
 0x120   :  { %3624 = vst [vmem:[#allocation21_spill] sm:$0xff] %v3056_v57  ;;  %v517_v57 = vunpack.c.l.bf16 %v2980_v63  ;;  %2302 = vrcp.f32 %v795_v53 }
 0x121   :  { %3625 = vst [vmem:[#allocation22_spill] sm:$0xff] %v3058_v6  ;;  %v398_v46 = vpop.f32.mrb[36].mxu1  ;;  %v784_v6 = vadd.f32 1.0, %v2299_v55  ;;  %2304 = vrcp.f32 %v796_v7 }
 0x122   :  { %v399_v48 = vadd.f32 %v398_v46, %v2964_v5  ;;  %v400_v17 = vpop.f32.mrb[37].mxu1  ;;  %v516_v46 = vunpack.c.l.bf16 %v2976_v61 }
 0x123   :  { %v401_v52 = vadd.f32 %v400_v17, %v2966_v34  ;;  %v402_v50 = vpop.f32.mrb[38].mxu1 }
 0x124   :  { %v403_v25 = vadd.f32 %v402_v50, %v2964_v5  ;;  %v404_v45 = vpop.f32.mrb[39].mxu1 }
 0x125   :  { %v405_v56 = vadd.f32 %v404_v45, %v2966_v34 }
 0x126   :  { %v3064_v1 = vpack.c.bf16 %v403_v25, %v399_v48  ;;  %v521_v48 = vunpack.c.h.bf16 %v2980_v63 }
 0x127   :  { %v3066_v11 = vpack.c.bf16 %v405_v56, %v401_v52  ;;  %v2301_v56 = vpop.eup %2300 }
 0x128   :  { %3626 = vst [vmem:[#allocation23_spill] sm:$0xff] %v3064_v1 }
 0x129   :  { %3627 = vst [vmem:[#allocation24_spill] sm:$0xff] %v3066_v11  ;;  %v760_v17 = vpop.f32.mrb[40].mxu1 }
 0x12a   :  { %v771_v5 = vadd.f32 %v760_v17, %v516_v46  ;;  %v762_v50 = vpop.f32.mrb[41].mxu1  ;;  %v2303_v55 = vpop.eup %2302 }
 0x12b   :  { %v772_v34 = vadd.f32 %v762_v50, %v517_v57  ;;  %v764_v54 = vpop.f32.mrb[42].mxu1  ;;  %v2305_v53 = vpop.eup %2304  ;;  %v815_v7 = vmul.f32 0.0, %v2303_v55 }
 0x12c   :  { %2306 = vtanh.f32 %v771_v5  ;;  %v775_v52 = vadd.f32 %v764_v54, %v520_v0  ;;  %v766_v41 = vpop.f32.mrb[43].mxu1  ;;  %v816_v63 = vmul.f32 0.0, %v2305_v53  ;;  %v3628_v53 = vmov 0  }
 0x12d   :  { %2308 = vrcp.f32 %v784_v6  ;;  %v2134_v25 = vmul.f32 -1.442695, %v772_v34  ;;  %v776_v45 = vadd.f32 %v766_v41, %v521_v48 }
 0x12e   :  { %2310 = vtanh.f32 %v775_v52 }
 0x12f   :  { %2312 = vpow2.f32 %v2134_v25  ;;  %v2135_v58 = vmul.f32 -1.442695, %v776_v45 }
 0x131   :  { %2314 = vpow2.f32 %v2135_v58 }
 0x136   :  { %v2307_v46 = vpop.eup %2306 }
 0x137   :  { %v2309_v61 = vpop.eup %2308  ;;  %v817_v57 = vmul.f32 %v2307_v46, %v2301_v56 }
 0x138   :  { %v2311_v17 = vpop.eup %2310 }
 0x139   :  { %v2313_v50 = vpop.eup %2312  ;;  %v3072_v5 = vadd.f32 %v817_v57, %v815_v7  ;;  %v818_v0 = vmul.f32 %v2311_v17, %v2309_v61 }
 0x13a   :  { %v809_v6 = vadd.f32 1.0, %v2313_v50  ;;  %v836_v50 = vunpack.c.h.bf16 %v2958_v2 }
 0x13b   :  { %v2315_v34 = vpop.eup %2314  ;;  %2316 = vtanh.f32 %v3072_v5  ;;  %v3075_v54 = vadd.f32 %v818_v0, %v816_v63 }
 0x13c   :  { %2318 = vrcp.f32 %v809_v6  ;;  %v810_v48 = vadd.f32 1.0, %v2315_v34  ;;  %v837_v34 = vunpack.c.h.bf16 %v2962_v4 }
 0x13d   :  { %2320 = vtanh.f32 %v3075_v54 }
 0x13e   :  { %2322 = vrcp.f32 %v810_v48 }
 0x145   :  { %v2317_v52 = vpop.eup %2316 }
 0x146   :  { %v2319_v41 = vpop.eup %2318 }
 0x147   :  { %v2321_v25 = vpop.eup %2320  ;;  %v823_v58 = vmul.f32 %v2319_v41, %v2317_v52 }
 0x148   :  { %v2323_v45 = vpop.eup %2322 }
 0x149   :  { %v824_v56 = vmul.f32 %v2323_v45, %v2321_v25 }
 0x14b   :  { %v840_v55 = vpack.c.bf16 %v824_v56, %v823_v58 }
 0x14d   :  { %874 = vmatmul.mubr.bf16.vlgmr.msra.gmra.mrb[28].mxu0 %v840_v55  ;;  %917 = vmatmul.mubr.bf16.vlgmr.msra.gmra.mrb[44].mxu1 %v840_v55 }
 0x14e   :  { %1000 = vmatpush1.bf16.msra.mxu0 %v2662_v10  ;;  %1043 = vmatpush1.bf16.msra.mxu1 %v2711_v18  ;;  %v832_v10 = vunpack.c.l.bf16 %v2958_v2 }
 0x14f   :  { %1001 = vmatprep.subr.bf16.mxu0 %v2675_v12  ;;  %1044 = vmatprep.subr.bf16.mxu1 %v2716_v19  ;;  %v834_v12 = vunpack.c.l.bf16 %v2992_v60 }
 0x150   :  { %1031 = vmatprep.mubr.bf16.mxu0 %v3628_v53  ;;  %1074 = vmatprep.mubr.bf16.mxu1 %v3628_v53 }
 0x152   :  { %1002 = vmatpush1.bf16.msra.mxu0 %v2680_v13  ;;  %1045 = vmatpush1.bf16.msra.mxu1 %v2737_v22 }
 0x153   :  { %1003 = vmatprep.subr.bf16.mxu0 %v2686_v14  ;;  %1046 = vmatprep.subr.bf16.mxu1 %v2744_v23 }
 0x156   :  { %1004 = vmatpush1.bf16.msra.mxu0 %v2697_v15  ;;  %1047 = vmatpush1.bf16.msra.mxu1 %v2760_v26  ;;  %v833_v15 = vunpack.c.l.bf16 %v2962_v4 }
 0x157   :  { %1005 = vmatprep.subr.bf16.mxu0 %v2703_v16  ;;  %1048 = vmatprep.subr.bf16.mxu1 %v2777_v29  ;;  %v3629_v16 = vld [vmem:[#allocation12_spill] sm:$0xff] }
 0x158   :  { %v835_v46 = vunpack.c.l.bf16 %v3629_v16  ;;  %v839_v48 = vunpack.c.h.bf16 %v3629_v16 }
 0x15a   :  { %1006 = vmatpush1.bf16.msra.mxu0 %v2723_v20  ;;  %1049 = vmatpush1.bf16.msra.mxu1 %v2793_v31 }
 0x15b   :  { %1007 = vmatprep.subr.bf16.mxu0 %v2730_v21  ;;  %1050 = vmatprep.subr.bf16.mxu1 %v2805_v33 }
 0x15e   :  { %1008 = vmatpush1.bf16.msra.mxu0 %v2750_v24  ;;  %1051 = vmatpush1.bf16.msra.mxu1 %v2820_v36 }
 0x15f   :  { %1009 = vmatprep.subr.bf16.mxu0 %v2765_v27  ;;  %1052 = vmatprep.subr.bf16.mxu1 %v2832_v38 }
 0x162   :  { %1010 = vmatpush1.bf16.msra.mxu0 %v2771_v28  ;;  %1053 = vmatpush1.bf16.msra.mxu1 %v2843_v39 }
 0x163   :  { %1011 = vmatprep.subr.bf16.mxu0 %v2784_v30  ;;  %1054 = vmatprep.subr.bf16.mxu1 %v2850_v40 }
 0x166   :  { %1012 = vmatpush1.bf16.msra.mxu0 %v2800_v32  ;;  %1055 = vmatpush1.bf16.msra.mxu1 %v2860_v42 }
 0x167   :  { %1013 = vmatprep.subr.bf16.mxu0 %v2815_v35  ;;  %1056 = vmatprep.subr.bf16.mxu1 %v2866_v43 }
 0x16a   :  { %1014 = vmatpush1.bf16.msra.mxu0 %v2826_v37  ;;  %1057 = vmatpush1.bf16.msra.mxu1 %v2876_v44 }
 0x16b   :  { %1157 = vmatprep.subr.bf16.mxu0 %v2652_v8  ;;  %1200 = vmatprep.subr.bf16.mxu1 %v2657_v9  ;;  %v838_v8 = vunpack.c.h.bf16 %v2992_v60 }
 0x220   :  { %v875_v13 = vpop.f32.mrb[28].mxu0  ;;  %v918_v14 = vpop.f32.mrb[44].mxu1 }
 0x221   :  { %v927_v61 = vadd.f32 %v875_v13, %v832_v10  ;;  %v929_v7 = vadd.f32 %v918_v14, %v834_v12  ;;  %v877_v57 = vpop.f32.mrb[29].mxu0  ;;  %v920_v17 = vpop.f32.mrb[45].mxu1 }
 0x222   :  { %v928_v63 = vadd.f32 %v877_v57, %v833_v15  ;;  %v930_v9 = vadd.f32 %v920_v17, %v835_v46  ;;  %v879_v0 = vpop.f32.mrb[30].mxu0  ;;  %v922_v6 = vpop.f32.mrb[46].mxu1 }
 0x223   :  { %v2136_v52 = vmul.f32 -1.442695, %v927_v61  ;;  %v931_v41 = vadd.f32 %v879_v0, %v836_v50  ;;  %v933_v25 = vadd.f32 %v922_v6, %v838_v8  ;;  %v881_v45 = vpop.f32.mrb[31].mxu0  ;;  %v924_v58 = vpop.f32.mrb[47].mxu1 }
 0x224   :  { %v2138_v56 = vmul.f32 -1.442695, %v928_v63  ;;  %v932_v55 = vadd.f32 %v881_v45, %v837_v34  ;;  %v934_v10 = vadd.f32 %v924_v58, %v839_v48  ;;  %v2140_v12 = vmul.f32 -1.442695, %v930_v9 }
 0x225   :  { %2324 = vpow2.f32 %v2136_v52  ;;  %v2137_v2 = vmul.f32 -1.442695, %v931_v41 }
 0x226   :  { %2326 = vpow2.f32 %v2138_v56  ;;  %v2139_v60 = vmul.f32 -1.442695, %v932_v55  ;;  %v2141_v15 = vmul.f32 -1.442695, %v934_v10 }
 0x227   :  { %2328 = vpow2.f32 %v2137_v2 }
 0x228   :  { %2330 = vpow2.f32 %v2139_v60 }
 0x229   :  { %2332 = vtanh.f32 %v929_v7 }
 0x22a   :  { %2334 = vpow2.f32 %v2140_v12 }
 0x22b   :  { %2336 = vtanh.f32 %v933_v25 }
 0x22f   :  { %v2325_v13 = vpop.eup %2324 }
 0x230   :  { %v2327_v4 = vpop.eup %2326  ;;  %v941_v14 = vadd.f32 1.0, %v2325_v13 }
 0x231   :  { %v953_v16 = vadd.f32 1.0, %v2327_v4  ;;  %v2329_v46 = vpop.eup %2328 }
 0x232   :  { %2338 = vrcp.f32 %v941_v14  ;;  %v942_v61 = vadd.f32 1.0, %v2329_v46  ;;  %v2331_v57 = vpop.eup %2330  ;;  %v3138_v14 = vld [vmem:[%s3581_s2 + $0x24] ss:$16 sps:$4 sm:$0xff]  }
 0x233   :  { %2340 = vrcp.f32 %v953_v16  ;;  %v954_v17 = vadd.f32 1.0, %v2331_v57  ;;  %v2333_v50 = vpop.eup %2332 }
 0x234   :  { %2342 = vpow2.f32 %v2141_v15  ;;  %v2335_v8 = vpop.eup %2334  ;;  %v3147_v15 = vld [vmem:[%s3581_s2 + $0x20] ss:$16 sps:$4 sm:$0xff]  }
 0x235   :  { %2344 = vrcp.f32 %v942_v61  ;;  %v2337_v63 = vpop.eup %2336  ;;  %v967_v52 = vadd.f32 1.0, %v2335_v8 }
 0x236   :  { %2346 = vrcp.f32 %v954_v17 }
 0x237   :  { %2348 = vrcp.f32 %v967_v52 }
 0x23c   :  { %v2339_v9 = vpop.eup %2338 }
 0x23d   :  { %v2341_v7 = vpop.eup %2340  ;;  %v975_v0 = vmul.f32 %v2339_v9, %v2333_v50 }
 0x23e   :  { %v2343_v6 = vpop.eup %2342  ;;  %v973_v34 = vmul.f32 %v2341_v7, %v3072_v5 }
 0x23f   :  { %v2345_v48 = vpop.eup %2344  ;;  %v968_v58 = vadd.f32 1.0, %v2343_v6 }
 0x240   :  { %v3121_v41 = vadd.f32 %v975_v0, %v973_v34  ;;  %v976_v25 = vmul.f32 %v2345_v48, %v2337_v63  ;;  %v2347_v45 = vpop.eup %2346 }
 0x241   :  { %v974_v56 = vmul.f32 %v2347_v45, %v3075_v54  ;;  %v2349_v10 = vpop.eup %2348  ;;  %v3131_v54 = vld [vmem:[%s3581_s2] ss:$16 sps:$4 sm:$0xff]  }
 0x242   :  { %2350 = vtanh.f32 %v3121_v41 }
 0x243   :  { %v3125_v55 = vadd.f32 %v976_v25, %v974_v56  ;;  %2352 = vrcp.f32 %v968_v58 }
 0x245   :  { %2354 = vtanh.f32 %v3125_v55 }
 0x24c   :  { %v2351_v2 = vpop.eup %2350 }
 0x24d   :  { %v2353_v5 = vpop.eup %2352  ;;  %v981_v12 = vmul.f32 %v2351_v2, %v2349_v10 }
 0x24f   :  { %v2355_v60 = vpop.eup %2354 }
 0x250   :  { %v982_v13 = vmul.f32 %v2355_v60, %v2353_v5 }
 0x252   :  { %v998_v4 = vpack.c.bf16 %v982_v13, %v981_v12 }
 0x254   :  { %1032 = vmatmul.mubr.bf16.vlgmr.msra.gmra.mrb[32].mxu0 %v998_v4  ;;  %1075 = vmatmul.mubr.bf16.vlgmr.msra.gmra.mrb[48].mxu1 %v998_v4 }
 0x255   :  { %1158 = vmatpush1.bf16.msra.mxu0 %v3131_v54  ;;  %1201 = vmatpush1.bf16.msra.mxu1 %v2711_v18  ;;  %v3154_v18 = vld [vmem:[%s3581_s2 + $0x44] ss:$16 sps:$4 sm:$0xff]  }
 0x256   :  { %1159 = vmatprep.subr.bf16.mxu0 %v3138_v14  ;;  %1202 = vmatprep.subr.bf16.mxu1 %v2716_v19  ;;  %v3161_v19 = vld [vmem:[%s3581_s2 + $0x40] ss:$16 sps:$4 sm:$0xff]  }
 0x257   :  { %1189 = vmatprep.mubr.bf16.mxu0 %v3628_v53  ;;  %1232 = vmatprep.mubr.bf16.mxu1 %v3628_v53 }
 0x259   :  { %1160 = vmatpush1.bf16.msra.mxu0 %v3147_v15  ;;  %1203 = vmatpush1.bf16.msra.mxu1 %v2737_v22  ;;  %v3168_v22 = vld [vmem:[%s3581_s2 + $0x64] ss:$16 sps:$4 sm:$0xff]  }
 0x25a   :  { %1161 = vmatprep.subr.bf16.mxu0 %v3154_v18  ;;  %1204 = vmatprep.subr.bf16.mxu1 %v2744_v23  ;;  %v3630_v23 = vld [vmem:[#allocation9_spill] sm:$0xff] }
 0x25d   :  { %1162 = vmatpush1.bf16.msra.mxu0 %v3161_v19  ;;  %1205 = vmatpush1.bf16.msra.mxu1 %v2760_v26  ;;  %v992_v26 = vunpack.c.l.bf16 %v3008_v59 }
 0x25e   :  { %1163 = vmatprep.subr.bf16.mxu0 %v3168_v22  ;;  %1206 = vmatprep.subr.bf16.mxu1 %v2777_v29  ;;  %v3631_v29 = vld [vmem:[#allocation10_spill] sm:$0xff] }
 0x25f   :  { %v995_v16 = vunpack.c.h.bf16 %v3631_v29 }
 0x261   :  { %1164 = vmatpush1.bf16.msra.mxu0 %v2723_v20  ;;  %1207 = vmatpush1.bf16.msra.mxu1 %v2793_v31  ;;  %v3193_v20 = vld [vmem:[%s3581_s2 + $0x4] ss:$16 sps:$4 sm:$0xff]  }
 0x262   :  { %1165 = vmatprep.subr.bf16.mxu0 %v2730_v21  ;;  %1208 = vmatprep.subr.bf16.mxu1 %v2805_v33  ;;  %v3199_v21 = vld [vmem:[%s3581_s2 + $0xc] ss:$16 sps:$4 sm:$0xff]   ;;  %v3632_v31 = vld [vmem:[#allocation15_spill] sm:$0xff] }
 0x263   :  { %v997_v46 = vunpack.c.h.bf16 %v3632_v31 }
 0x265   :  { %1166 = vmatpush1.bf16.msra.mxu0 %v2750_v24  ;;  %1209 = vmatpush1.bf16.msra.mxu1 %v2820_v36  ;;  %v990_v24 = vunpack.c.l.bf16 %v3630_v23 }
 0x266   :  { %1167 = vmatprep.subr.bf16.mxu0 %v2765_v27  ;;  %1210 = vmatprep.subr.bf16.mxu1 %v2832_v38  ;;  %v994_v38 = vunpack.c.h.bf16 %v3630_v23 }
 0x269   :  { %1168 = vmatpush1.bf16.msra.mxu0 %v2771_v28  ;;  %1211 = vmatpush1.bf16.msra.mxu1 %v2843_v39  ;;  %v996_v39 = vunpack.c.h.bf16 %v3008_v59 }
 0x26a   :  { %1169 = vmatprep.subr.bf16.mxu0 %v2784_v30  ;;  %1212 = vmatprep.subr.bf16.mxu1 %v2850_v40  ;;  %v991_v30 = vunpack.c.l.bf16 %v3631_v29 }
 0x26d   :  { %1170 = vmatpush1.bf16.msra.mxu0 %v2800_v32  ;;  %1213 = vmatpush1.bf16.msra.mxu1 %v2860_v42  ;;  %v993_v32 = vunpack.c.l.bf16 %v3632_v31 }
 0x26e   :  { %1171 = vmatprep.subr.bf16.mxu0 %v2815_v35  ;;  %1214 = vmatprep.subr.bf16.mxu1 %v2866_v43 }
 0x271   :  { %1172 = vmatpush1.bf16.msra.mxu0 %v2826_v37  ;;  %1215 = vmatpush1.bf16.msra.mxu1 %v2876_v44 }
 0x272   :  { %1315 = vmatprep.subr.bf16.mxu0 %v3193_v20  ;;  %1358 = vmatprep.subr.bf16.mxu1 %v3199_v21 }
 0x327   :  { %v1033_v27 = vpop.f32.mrb[32].mxu0  ;;  %v1076_v28 = vpop.f32.mrb[48].mxu1 }
 0x328   :  { %v1085_v33 = vadd.f32 %v1033_v27, %v990_v24  ;;  %v1087_v35 = vadd.f32 %v1076_v28, %v992_v26  ;;  %v1035_v36 = vpop.f32.mrb[33].mxu0  ;;  %v1078_v37 = vpop.f32.mrb[49].mxu1 }
 0x329   :  { %v1086_v40 = vadd.f32 %v1035_v36, %v991_v30  ;;  %v1088_v42 = vadd.f32 %v1078_v37, %v993_v32  ;;  %v1037_v43 = vpop.f32.mrb[34].mxu0  ;;  %v1080_v44 = vpop.f32.mrb[50].mxu1 }
 0x32a   :  { %v2142_v61 = vmul.f32 -1.442695, %v1085_v33  ;;  %v1089_v57 = vadd.f32 %v1037_v43, %v994_v38  ;;  %v1091_v17 = vadd.f32 %v1080_v44, %v996_v39  ;;  %v1039_v50 = vpop.f32.mrb[35].mxu0  ;;  %v1082_v8 = vpop.f32.mrb[51].mxu1  ;;  %v3229_v43 = vld [vmem:[%s3581_s2 + $0x2c] ss:$16 sps:$4 sm:$0xff]  }
 0x32b   :  { %v2144_v63 = vmul.f32 -1.442695, %v1086_v40  ;;  %v1090_v9 = vadd.f32 %v1039_v50, %v995_v16  ;;  %v1092_v7 = vadd.f32 %v1082_v8, %v997_v46  ;;  %v2146_v6 = vmul.f32 -1.442695, %v1088_v42  ;;  %v3238_v44 = vld [vmem:[%s3581_s2 + $0x28] ss:$16 sps:$4 sm:$0xff]  }
 0x32c   :  { %2356 = vpow2.f32 %v2142_v61  ;;  %v2143_v0 = vmul.f32 -1.442695, %v1089_v57  ;;  %v3245_v16 = vld [vmem:[%s3581_s2 + $0x4c] ss:$16 sps:$4 sm:$0xff]   ;;  %v3252_v46 = vld [vmem:[%s3581_s2 + $0x48] ss:$16 sps:$4 sm:$0xff]  }
 0x32d   :  { %2358 = vpow2.f32 %v2144_v63  ;;  %v2145_v59 = vmul.f32 -1.442695, %v1090_v9  ;;  %v2147_v25 = vmul.f32 -1.442695, %v1092_v7  ;;  %v3259_v61 = vld [vmem:[%s3581_s2 + $0x6c] ss:$16 sps:$4 sm:$0xff]  }
 0x32e   :  { %2360 = vpow2.f32 %v2143_v0  ;;  %v3265_v57 = vld [vmem:[%s3581_s2 + $0x60] ss:$16 sps:$4 sm:$0xff]   ;;  %v3277_v50 = vld [vmem:[%s3581_s2 + $0x84] ss:$16 sps:$4 sm:$0xff]   ;;  %v3283_v8 = vld [vmem:[%s3581_s2 + $0x8c] ss:$16 sps:$4 sm:$0xff]  }
 0x32f   :  { %2362 = vpow2.f32 %v2145_v59  ;;  %v3289_v63 = vld [vmem:[%s3581_s2 + $0x80] ss:$16 sps:$4 sm:$0xff]   ;;  %v3295_v9 = vld [vmem:[%s3581_s2 + $0x88] ss:$16 sps:$4 sm:$0xff]   ;;  %v3301_v7 = vld [vmem:[%s3581_s2 + $0xa4] ss:$16 sps:$4 sm:$0xff]  }
 0x330   :  { %2364 = vtanh.f32 %v1087_v35  ;;  %v3307_v0 = vld [vmem:[%s3581_s2 + $0xac] ss:$16 sps:$4 sm:$0xff]   ;;  %v3313_v59 = vld [vmem:[%s3581_s2 + $0xa0] ss:$16 sps:$4 sm:$0xff]  }
 0x331   :  { %2366 = vpow2.f32 %v2146_v6  ;;  %v3319_v6 = vld [vmem:[%s3581_s2 + $0xa8] ss:$16 sps:$4 sm:$0xff]  }
 0x332   :  { %2368 = vtanh.f32 %v1091_v17  ;;  %v3271_v17 = vld [vmem:[%s3581_s2 + $0x68] ss:$16 sps:$4 sm:$0xff]  }
 0x336   :  { %v2357_v34 = vpop.eup %2356 }
 0x337   :  { %v2359_v48 = vpop.eup %2358  ;;  %v1099_v52 = vadd.f32 1.0, %v2357_v34  ;;  %v3325_v34 = vld [vmem:[%s3581_s2 + $0xc4] ss:$16 sps:$4 sm:$0xff]  }
 0x338   :  { %v1111_v45 = vadd.f32 1.0, %v2359_v48  ;;  %v2361_v58 = vpop.eup %2360  ;;  %v3331_v48 = vld [vmem:[%s3581_s2 + $0xcc] ss:$16 sps:$4 sm:$0xff]  }
 0x339   :  { %2370 = vrcp.f32 %v1099_v52  ;;  %v1100_v56 = vadd.f32 1.0, %v2361_v58  ;;  %v2363_v10 = vpop.eup %2362  ;;  %v3337_v52 = vld [vmem:[%s3581_s2 + $0xc0] ss:$16 sps:$4 sm:$0xff]   ;;  %v3355_v58 = vld [vmem:[%s3581_s2 + $0xec] ss:$16 sps:$4 sm:$0xff]  }
 0x33a   :  { %2372 = vrcp.f32 %v1111_v45  ;;  %v1112_v2 = vadd.f32 1.0, %v2363_v10  ;;  %v2365_v5 = vpop.eup %2364  ;;  %v3349_v45 = vld [vmem:[%s3581_s2 + $0xe4] ss:$16 sps:$4 sm:$0xff]   ;;  %v3367_v10 = vld [vmem:[%s3581_s2 + $0xe8] ss:$16 sps:$4 sm:$0xff]  }
 0x33b   :  { %2374 = vpow2.f32 %v2147_v25  ;;  %v2367_v60 = vpop.eup %2366  ;;  %v3343_v25 = vld [vmem:[%s3581_s2 + $0xc8] ss:$16 sps:$4 sm:$0xff]  }
 0x33c   :  { %2376 = vrcp.f32 %v1100_v56  ;;  %v2369_v12 = vpop.eup %2368  ;;  %v1125_v28 = vadd.f32 1.0, %v2367_v60  ;;  %v3361_v56 = vld [vmem:[%s3581_s2 + $0xe0] ss:$16 sps:$4 sm:$0xff]   ;;  %v1150_v60 = vunpack.c.l.bf16 %v3024_v49 }
 0x33d   :  { %2378 = vrcp.f32 %v1112_v2  ;;  %v3633_v2 = vld [vmem:[#allocation11_spill] sm:$0xff] }
 0x33e   :  { %2380 = vrcp.f32 %v1125_v28 }
 0x343   :  { %v2371_v13 = vpop.eup %2370 }
 0x344   :  { %v2373_v4 = vpop.eup %2372  ;;  %v1133_v23 = vmul.f32 %v2371_v13, %v2365_v5  ;;  %v1148_v5 = vunpack.c.l.bf16 %v3633_v2 }
 0x345   :  { %v2375_v24 = vpop.eup %2374  ;;  %v1131_v26 = vmul.f32 %v2373_v4, %v3121_v41  ;;  %v3634_v4 = vld [vmem:[#allocation13_spill] sm:$0xff] }
 0x346   :  { %v2377_v27 = vpop.eup %2376  ;;  %v1126_v32 = vadd.f32 1.0, %v2375_v24  ;;  %v3635_v24 = vld [vmem:[#allocation18_spill] sm:$0xff] }
 0x347   :  { %v3211_v29 = vadd.f32 %v1133_v23, %v1131_v26  ;;  %v1134_v30 = vmul.f32 %v2377_v27, %v2369_v12  ;;  %v2379_v31 = vpop.eup %2378  ;;  %v1149_v23 = vunpack.c.l.bf16 %v3634_v4  ;;  %v1151_v26 = vunpack.c.l.bf16 %v3635_v24 }
 0x348   :  { %v1132_v33 = vmul.f32 %v2379_v31, %v3125_v55  ;;  %v2381_v36 = vpop.eup %2380  ;;  %v3222_v55 = vld [vmem:[%s3581_s2 + $0x8] ss:$16 sps:$4 sm:$0xff]  }
 0x349   :  { %2382 = vtanh.f32 %v3211_v29 }
 0x34a   :  { %v3215_v35 = vadd.f32 %v1134_v30, %v1132_v33  ;;  %2384 = vrcp.f32 %v1126_v32  ;;  %v1152_v32 = vunpack.c.h.bf16 %v3633_v2  ;;  %v1154_v33 = vunpack.c.h.bf16 %v3024_v49 }
 0x34c   :  { %2386 = vtanh.f32 %v3215_v35 }
 0x353   :  { %v2383_v37 = vpop.eup %2382 }
 0x354   :  { %v2385_v41 = vpop.eup %2384  ;;  %v1139_v39 = vmul.f32 %v2383_v37, %v2381_v36 }
 0x356   :  { %v2387_v38 = vpop.eup %2386 }
 0x357   :  { %v1140_v40 = vmul.f32 %v2387_v38, %v2385_v41 }
 0x359   :  { %v1156_v42 = vpack.c.bf16 %v1140_v40, %v1139_v39  ;;  %v1153_v39 = vunpack.c.h.bf16 %v3634_v4  ;;  %v1155_v40 = vunpack.c.h.bf16 %v3635_v24 }
 0x35b   :  { %1190 = vmatmul.mubr.bf16.vlgmr.msra.gmra.mrb[36].mxu0 %v1156_v42  ;;  %1233 = vmatmul.mubr.bf16.vlgmr.msra.gmra.mrb[52].mxu1 %v1156_v42 }
 0x35c   :  { %1316 = vmatpush1.bf16.msra.mxu0 %v3131_v54  ;;  %1359 = vmatpush1.bf16.msra.mxu1 %v3222_v55 }
 0x35d   :  { %1317 = vmatprep.subr.bf16.mxu0 %v3138_v14  ;;  %1360 = vmatprep.subr.bf16.mxu1 %v3229_v43 }
 0x35e   :  { %1347 = vmatprep.mubr.bf16.mxu0 %v3628_v53  ;;  %1390 = vmatprep.mubr.bf16.mxu1 %v3628_v53 }
 0x360   :  { %1318 = vmatpush1.bf16.msra.mxu0 %v3147_v15  ;;  %1361 = vmatpush1.bf16.msra.mxu1 %v3238_v44 }
 0x361   :  { %1319 = vmatprep.subr.bf16.mxu0 %v3154_v18  ;;  %1362 = vmatprep.subr.bf16.mxu1 %v3245_v16 }
 0x364   :  { %1320 = vmatpush1.bf16.msra.mxu0 %v3161_v19  ;;  %1363 = vmatpush1.bf16.msra.mxu1 %v3252_v46 }
 0x365   :  { %1321 = vmatprep.subr.bf16.mxu0 %v3168_v22  ;;  %1364 = vmatprep.subr.bf16.mxu1 %v3259_v61 }
 0x368   :  { %1322 = vmatpush1.bf16.msra.mxu0 %v3265_v57  ;;  %1365 = vmatpush1.bf16.msra.mxu1 %v3271_v17 }
 0x369   :  { %1323 = vmatprep.subr.bf16.mxu0 %v3277_v50  ;;  %1366 = vmatprep.subr.bf16.mxu1 %v3283_v8 }
 0x36c   :  { %1324 = vmatpush1.bf16.msra.mxu0 %v3289_v63  ;;  %1367 = vmatpush1.bf16.msra.mxu1 %v3295_v9 }
 0x36d   :  { %1325 = vmatprep.subr.bf16.mxu0 %v3301_v7  ;;  %1368 = vmatprep.subr.bf16.mxu1 %v3307_v0 }
 0x370   :  { %1326 = vmatpush1.bf16.msra.mxu0 %v3313_v59  ;;  %1369 = vmatpush1.bf16.msra.mxu1 %v3319_v6 }
 0x371   :  { %1327 = vmatprep.subr.bf16.mxu0 %v3325_v34  ;;  %1370 = vmatprep.subr.bf16.mxu1 %v3331_v48 }
 0x374   :  { %1328 = vmatpush1.bf16.msra.mxu0 %v3337_v52  ;;  %1371 = vmatpush1.bf16.msra.mxu1 %v3343_v25 }
 0x375   :  { %1329 = vmatprep.subr.bf16.mxu0 %v3349_v45  ;;  %1372 = vmatprep.subr.bf16.mxu1 %v3355_v58 }
 0x378   :  { %1330 = vmatpush1.bf16.msra.mxu0 %v3361_v56  ;;  %1373 = vmatpush1.bf16.msra.mxu1 %v3367_v10 }
 0x379   :  { %1473 = vmatprep.subr.bf16.mxu0 %v3193_v20  ;;  %1516 = vmatprep.subr.bf16.mxu1 %v3199_v21 }
 0x42e   :  { %v1191_v12 = vpop.f32.mrb[36].mxu0  ;;  %v1234_v13 = vpop.f32.mrb[52].mxu1 }
 0x42f   :  { %v1243_v27 = vadd.f32 %v1191_v12, %v1148_v5  ;;  %v1245_v28 = vadd.f32 %v1234_v13, %v1150_v60  ;;  %v1193_v30 = vpop.f32.mrb[37].mxu0  ;;  %v1236_v31 = vpop.f32.mrb[53].mxu1 }
 0x430   :  { %v1244_v36 = vadd.f32 %v1193_v30, %v1149_v23  ;;  %v1246_v37 = vadd.f32 %v1236_v31, %v1151_v26  ;;  %v1195_v41 = vpop.f32.mrb[38].mxu0  ;;  %v1238_v38 = vpop.f32.mrb[54].mxu1 }
 0x431   :  { %v2148_v42 = vmul.f32 -1.442695, %v1243_v27  ;;  %v1247_v11 = vadd.f32 %v1195_v41, %v1152_v32  ;;  %v1249_v1 = vadd.f32 %v1238_v38, %v1154_v33  ;;  %v1197_v51 = vpop.f32.mrb[39].mxu0  ;;  %v1240_v5 = vpop.f32.mrb[55].mxu1 }
 0x432   :  { %v2150_v60 = vmul.f32 -1.442695, %v1244_v36  ;;  %v1248_v12 = vadd.f32 %v1197_v51, %v1153_v39  ;;  %v1250_v13 = vadd.f32 %v1240_v5, %v1155_v40  ;;  %v2152_v23 = vmul.f32 -1.442695, %v1246_v37 }
 0x433   :  { %2388 = vpow2.f32 %v2148_v42  ;;  %v2149_v2 = vmul.f32 -1.442695, %v1247_v11 }
 0x434   :  { %2390 = vpow2.f32 %v2150_v60  ;;  %v2151_v49 = vmul.f32 -1.442695, %v1248_v12  ;;  %v2153_v24 = vmul.f32 -1.442695, %v1250_v13 }
 0x435   :  { %2392 = vpow2.f32 %v2149_v2 }
 0x436   :  { %2394 = vpow2.f32 %v2151_v49 }
 0x437   :  { %2396 = vtanh.f32 %v1245_v28 }
 0x438   :  { %2398 = vpow2.f32 %v2152_v23 }
 0x439   :  { %2400 = vtanh.f32 %v1249_v1 }
 0x43d   :  { %v2389_v26 = vpop.eup %2388 }
 0x43e   :  { %v2391_v4 = vpop.eup %2390  ;;  %v1257_v30 = vadd.f32 1.0, %v2389_v26 }
 0x43f   :  { %v1269_v27 = vadd.f32 1.0, %v2391_v4  ;;  %v2393_v31 = vpop.eup %2392 }
 0x440   :  { %2402 = vrcp.f32 %v1257_v30  ;;  %v1258_v51 = vadd.f32 1.0, %v2393_v31  ;;  %v2395_v32 = vpop.eup %2394 }
 0x441   :  { %2404 = vrcp.f32 %v1269_v27  ;;  %v1270_v11 = vadd.f32 1.0, %v2395_v32  ;;  %v2397_v33 = vpop.eup %2396 }
 0x442   :  { %2406 = vpow2.f32 %v2153_v24  ;;  %v2399_v36 = vpop.eup %2398 }
 0x443   :  { %2408 = vrcp.f32 %v1258_v51  ;;  %v2401_v37 = vpop.eup %2400  ;;  %v1283_v1 = vadd.f32 1.0, %v2399_v36  ;;  %v1308_v51 = vunpack.c.l.bf16 %v3040_v62 }
 0x444   :  { %2410 = vrcp.f32 %v1270_v11 }
 0x445   :  { %2412 = vrcp.f32 %v1283_v1 }
 0x44a   :  { %v2403_v41 = vpop.eup %2402 }
 0x44b   :  { %v2405_v28 = vpop.eup %2404  ;;  %v1291_v38 = vmul.f32 %v2403_v41, %v2397_v33  ;;  %v3637_v33 = vld [vmem:[#allocation16_spill] sm:$0xff] }
 0x44c   :  { %v2407_v39 = vpop.eup %2406  ;;  %v1289_v40 = vmul.f32 %v2405_v28, %v3211_v29  ;;  %v1307_v36 = vunpack.c.l.bf16 %v3637_v33 }
 0x44d   :  { %v2409_v42 = vpop.eup %2408  ;;  %v1284_v13 = vadd.f32 1.0, %v2407_v39 }
 0x44e   :  { %v3381_v5 = vadd.f32 %v1291_v38, %v1289_v40  ;;  %v1292_v60 = vmul.f32 %v2409_v42, %v2401_v37  ;;  %v2411_v12 = vpop.eup %2410  ;;  %v1309_v37 = vunpack.c.l.bf16 %v3042_v47  ;;  %v1312_v42 = vunpack.c.h.bf16 %v3040_v62 }
 0x44f   :  { %v1290_v2 = vmul.f32 %v2411_v12, %v3215_v35  ;;  %v2413_v23 = vpop.eup %2412  ;;  %v3636_v35 = vld [vmem:[#allocation14_spill] sm:$0xff] }
 0x450   :  { %2414 = vtanh.f32 %v3381_v5  ;;  %v1306_v31 = vunpack.c.l.bf16 %v3636_v35  ;;  %v1310_v40 = vunpack.c.h.bf16 %v3636_v35 }
 0x451   :  { %v3385_v49 = vadd.f32 %v1292_v60, %v1290_v2  ;;  %2416 = vrcp.f32 %v1284_v13  ;;  %v1311_v2 = vunpack.c.h.bf16 %v3637_v33 }
 0x453   :  { %2418 = vtanh.f32 %v3385_v49 }
 0x45a   :  { %v2415_v26 = vpop.eup %2414 }
 0x45b   :  { %v2417_v29 = vpop.eup %2416  ;;  %v1297_v30 = vmul.f32 %v2415_v26, %v2413_v23  ;;  %v1313_v23 = vunpack.c.h.bf16 %v3042_v47 }
 0x45d   :  { %v2419_v4 = vpop.eup %2418 }
 0x45e   :  { %v1298_v24 = vmul.f32 %v2419_v4, %v2417_v29 }
 0x460   :  { %v1314_v27 = vpack.c.bf16 %v1298_v24, %v1297_v30 }
 0x462   :  { %1348 = vmatmul.mubr.bf16.vlgmr.msra.gmra.mrb[40].mxu0 %v1314_v27  ;;  %1391 = vmatmul.mubr.bf16.vlgmr.msra.gmra.mrb[56].mxu1 %v1314_v27 }
 0x463   :  { %1474 = vmatpush1.bf16.msra.mxu0 %v3131_v54  ;;  %1517 = vmatpush1.bf16.msra.mxu1 %v3222_v55 }
 0x464   :  { %1475 = vmatprep.subr.bf16.mxu0 %v3138_v14  ;;  %1518 = vmatprep.subr.bf16.mxu1 %v3229_v43 }
 0x465   :  { %1505 = vmatprep.mubr.bf16.mxu0 %v3628_v53  ;;  %1548 = vmatprep.mubr.bf16.mxu1 %v3628_v53 }
 0x467   :  { %1476 = vmatpush1.bf16.msra.mxu0 %v3147_v15  ;;  %1519 = vmatpush1.bf16.msra.mxu1 %v3238_v44 }
 0x468   :  { %1477 = vmatprep.subr.bf16.mxu0 %v3154_v18  ;;  %1520 = vmatprep.subr.bf16.mxu1 %v3245_v16 }
 0x46b   :  { %1478 = vmatpush1.bf16.msra.mxu0 %v3161_v19  ;;  %1521 = vmatpush1.bf16.msra.mxu1 %v3252_v46 }
 0x46c   :  { %1479 = vmatprep.subr.bf16.mxu0 %v3168_v22  ;;  %1522 = vmatprep.subr.bf16.mxu1 %v3259_v61 }
 0x46f   :  { %1480 = vmatpush1.bf16.msra.mxu0 %v3265_v57  ;;  %1523 = vmatpush1.bf16.msra.mxu1 %v3271_v17 }
 0x470   :  { %1481 = vmatprep.subr.bf16.mxu0 %v3277_v50  ;;  %1524 = vmatprep.subr.bf16.mxu1 %v3283_v8 }
 0x473   :  { %1482 = vmatpush1.bf16.msra.mxu0 %v3289_v63  ;;  %1525 = vmatpush1.bf16.msra.mxu1 %v3295_v9 }
 0x474   :  { %1483 = vmatprep.subr.bf16.mxu0 %v3301_v7  ;;  %1526 = vmatprep.subr.bf16.mxu1 %v3307_v0 }
 0x477   :  { %1484 = vmatpush1.bf16.msra.mxu0 %v3313_v59  ;;  %1527 = vmatpush1.bf16.msra.mxu1 %v3319_v6 }
 0x478   :  { %1485 = vmatprep.subr.bf16.mxu0 %v3325_v34  ;;  %1528 = vmatprep.subr.bf16.mxu1 %v3331_v48 }
 0x47b   :  { %1486 = vmatpush1.bf16.msra.mxu0 %v3337_v52  ;;  %1529 = vmatpush1.bf16.msra.mxu1 %v3343_v25 }
 0x47c   :  { %1487 = vmatprep.subr.bf16.mxu0 %v3349_v45  ;;  %1530 = vmatprep.subr.bf16.mxu1 %v3355_v58 }
 0x47f   :  { %1488 = vmatpush1.bf16.msra.mxu0 %v3361_v56  ;;  %1531 = vmatpush1.bf16.msra.mxu1 %v3367_v10 }
 0x480   :  { %1631 = vmatprep.subr.bf16.mxu0 %v3193_v20  ;;  %1674 = vmatprep.subr.bf16.mxu1 %v3199_v21 }
 0x535   :  { %v1349_v32 = vpop.f32.mrb[40].mxu0  ;;  %v1392_v11 = vpop.f32.mrb[56].mxu1 }
 0x536   :  { %v1401_v41 = vadd.f32 %v1349_v32, %v1306_v31  ;;  %v1403_v28 = vadd.f32 %v1392_v11, %v1308_v51  ;;  %v1351_v38 = vpop.f32.mrb[41].mxu0  ;;  %v1394_v39 = vpop.f32.mrb[57].mxu1 }
 0x537   :  { %v1402_v1 = vadd.f32 %v1351_v38, %v1307_v36  ;;  %v1404_v60 = vadd.f32 %v1394_v39, %v1309_v37  ;;  %v1353_v12 = vpop.f32.mrb[42].mxu0  ;;  %v1396_v13 = vpop.f32.mrb[58].mxu1 }
 0x538   :  { %v2154_v26 = vmul.f32 -1.442695, %v1401_v41  ;;  %v1405_v29 = vadd.f32 %v1353_v12, %v1310_v40  ;;  %v1407_v4 = vadd.f32 %v1396_v13, %v1312_v42  ;;  %v1355_v30 = vpop.f32.mrb[43].mxu0  ;;  %v1398_v24 = vpop.f32.mrb[59].mxu1 }
 0x539   :  { %v2156_v27 = vmul.f32 -1.442695, %v1402_v1  ;;  %v1406_v31 = vadd.f32 %v1355_v30, %v1311_v2  ;;  %v1408_v51 = vadd.f32 %v1398_v24, %v1313_v23  ;;  %v2158_v32 = vmul.f32 -1.442695, %v1404_v60 }
 0x53a   :  { %2420 = vpow2.f32 %v2154_v26  ;;  %v2155_v35 = vmul.f32 -1.442695, %v1405_v29 }
 0x53b   :  { %2422 = vpow2.f32 %v2156_v27  ;;  %v2157_v62 = vmul.f32 -1.442695, %v1406_v31  ;;  %v2159_v47 = vmul.f32 -1.442695, %v1408_v51 }
 0x53c   :  { %2424 = vpow2.f32 %v2155_v35 }
 0x53d   :  { %2426 = vpow2.f32 %v2157_v62 }
 0x53e   :  { %2428 = vtanh.f32 %v1403_v28 }
 0x53f   :  { %2430 = vpow2.f32 %v2158_v32 }
 0x540   :  { %2432 = vtanh.f32 %v1407_v4 }
 0x544   :  { %v2421_v11 = vpop.eup %2420 }
 0x545   :  { %v2423_v33 = vpop.eup %2422  ;;  %v1415_v36 = vadd.f32 1.0, %v2421_v11 }
 0x546   :  { %v1427_v37 = vadd.f32 1.0, %v2423_v33  ;;  %v2425_v41 = vpop.eup %2424 }
 0x547   :  { %2434 = vrcp.f32 %v1415_v36  ;;  %v1416_v38 = vadd.f32 1.0, %v2425_v41  ;;  %v2427_v39 = vpop.eup %2426 }
 0x548   :  { %2436 = vrcp.f32 %v1427_v37  ;;  %v1428_v40 = vadd.f32 1.0, %v2427_v39  ;;  %v2429_v42 = vpop.eup %2428  ;;  %v1466_v37 = vunpack.c.l.bf16 %v3048_v3  ;;  %v3639_v39 = vld [vmem:[#allocation19_spill] sm:$0xff] }
 0x549   :  { %2438 = vpow2.f32 %v2159_v47  ;;  %v2431_v1 = vpop.eup %2430 }
 0x54a   :  { %2440 = vrcp.f32 %v1416_v38  ;;  %v2433_v60 = vpop.eup %2432  ;;  %v1441_v29 = vadd.f32 1.0, %v2431_v1 }
 0x54b   :  { %2442 = vrcp.f32 %v1428_v40  ;;  %v1465_v40 = vunpack.c.l.bf16 %v3639_v39 }
 0x54c   :  { %2444 = vrcp.f32 %v1441_v29 }
 0x551   :  { %v2435_v12 = vpop.eup %2434 }
 0x552   :  { %v2437_v28 = vpop.eup %2436  ;;  %v1449_v13 = vmul.f32 %v2435_v12, %v2429_v42  ;;  %v3640_v42 = vld [vmem:[#allocation20_spill] sm:$0xff] }
 0x553   :  { %v2439_v2 = vpop.eup %2438  ;;  %v1447_v23 = vmul.f32 %v2437_v28, %v3381_v5  ;;  %v1467_v1 = vunpack.c.l.bf16 %v3640_v42 }
 0x554   :  { %v2441_v26 = vpop.eup %2440  ;;  %v1442_v27 = vadd.f32 1.0, %v2439_v2 }
 0x555   :  { %v3431_v4 = vadd.f32 %v1449_v13, %v1447_v23  ;;  %v1450_v30 = vmul.f32 %v2441_v26, %v2433_v60  ;;  %v2443_v24 = vpop.eup %2442 }
 0x556   :  { %v1448_v31 = vmul.f32 %v2443_v24, %v3385_v49  ;;  %v2445_v35 = vpop.eup %2444  ;;  %v3638_v49 = vld [vmem:[#allocation17_spill] sm:$0xff]  ;;  %v1471_v24 = vunpack.c.h.bf16 %v3640_v42 }
 0x557   :  { %2446 = vtanh.f32 %v3431_v4  ;;  %v1464_v47 = vunpack.c.l.bf16 %v3638_v49  ;;  %v1468_v2 = vunpack.c.h.bf16 %v3638_v49 }
 0x558   :  { %v3435_v51 = vadd.f32 %v1450_v30, %v1448_v31  ;;  %2448 = vrcp.f32 %v1442_v27  ;;  %v1469_v30 = vunpack.c.h.bf16 %v3639_v39 }
 0x55a   :  { %2450 = vtanh.f32 %v3435_v51 }
 0x561   :  { %v2447_v62 = vpop.eup %2446 }
 0x562   :  { %v2449_v5 = vpop.eup %2448  ;;  %v1455_v11 = vmul.f32 %v2447_v62, %v2445_v35 }
 0x564   :  { %v2451_v32 = vpop.eup %2450 }
 0x565   :  { %v1456_v33 = vmul.f32 %v2451_v32, %v2449_v5 }
 0x567   :  { %v1472_v36 = vpack.c.bf16 %v1456_v33, %v1455_v11 }
 0x569   :  { %1506 = vmatmul.mubr.bf16.vlgmr.msra.gmra.mrb[44].mxu0 %v1472_v36  ;;  %1549 = vmatmul.mubr.bf16.vlgmr.msra.gmra.mrb[60].mxu1 %v1472_v36 }
 0x56a   :  { %1632 = vmatpush1.bf16.msra.mxu0 %v3131_v54  ;;  %1675 = vmatpush1.bf16.msra.mxu1 %v3222_v55 }
 0x56b   :  { %1633 = vmatprep.subr.bf16.mxu0 %v3138_v14  ;;  %1676 = vmatprep.subr.bf16.mxu1 %v3229_v43 }
 0x56c   :  { %1663 = vmatprep.mubr.bf16.mxu0 %v3628_v53  ;;  %1706 = vmatprep.mubr.bf16.mxu1 %v3628_v53 }
 0x56e   :  { %1634 = vmatpush1.bf16.msra.mxu0 %v3147_v15  ;;  %1677 = vmatpush1.bf16.msra.mxu1 %v3238_v44 }
 0x56f   :  { %1635 = vmatprep.subr.bf16.mxu0 %v3154_v18  ;;  %1678 = vmatprep.subr.bf16.mxu1 %v3245_v16 }
 0x572   :  { %1636 = vmatpush1.bf16.msra.mxu0 %v3161_v19  ;;  %1679 = vmatpush1.bf16.msra.mxu1 %v3252_v46 }
 0x573   :  { %1637 = vmatprep.subr.bf16.mxu0 %v3168_v22  ;;  %1680 = vmatprep.subr.bf16.mxu1 %v3259_v61 }
 0x576   :  { %1638 = vmatpush1.bf16.msra.mxu0 %v3265_v57  ;;  %1681 = vmatpush1.bf16.msra.mxu1 %v3271_v17 }
 0x577   :  { %1639 = vmatprep.subr.bf16.mxu0 %v3277_v50  ;;  %1682 = vmatprep.subr.bf16.mxu1 %v3283_v8 }
 0x57a   :  { %1640 = vmatpush1.bf16.msra.mxu0 %v3289_v63  ;;  %1683 = vmatpush1.bf16.msra.mxu1 %v3295_v9 }
 0x57b   :  { %1641 = vmatprep.subr.bf16.mxu0 %v3301_v7  ;;  %1684 = vmatprep.subr.bf16.mxu1 %v3307_v0 }
 0x57e   :  { %1642 = vmatpush1.bf16.msra.mxu0 %v3313_v59  ;;  %1685 = vmatpush1.bf16.msra.mxu1 %v3319_v6 }
 0x57f   :  { %1643 = vmatprep.subr.bf16.mxu0 %v3325_v34  ;;  %1686 = vmatprep.subr.bf16.mxu1 %v3331_v48 }
 0x582   :  { %1644 = vmatpush1.bf16.msra.mxu0 %v3337_v52  ;;  %1687 = vmatpush1.bf16.msra.mxu1 %v3343_v25 }
 0x583   :  { %1645 = vmatprep.subr.bf16.mxu0 %v3349_v45  ;;  %1688 = vmatprep.subr.bf16.mxu1 %v3355_v58 }
 0x586   :  { %1646 = vmatpush1.bf16.msra.mxu0 %v3361_v56  ;;  %1689 = vmatpush1.bf16.msra.mxu1 %v3367_v10 }
 0x587   :  { %1789 = vmatprep.subr.bf16.mxu0 %v3193_v20  ;;  %1832 = vmatprep.subr.bf16.mxu1 %v3199_v21  ;;  %v1470_v20 = vunpack.c.h.bf16 %v3048_v3 }
 0x63c   :  { %v1507_v41 = vpop.f32.mrb[44].mxu0  ;;  %v1550_v38 = vpop.f32.mrb[60].mxu1 }
 0x63d   :  { %v1559_v60 = vadd.f32 %v1507_v41, %v1464_v47  ;;  %v1561_v12 = vadd.f32 %v1550_v38, %v1466_v37  ;;  %v1509_v28 = vpop.f32.mrb[45].mxu0  ;;  %v1552_v13 = vpop.f32.mrb[61].mxu1 }
 0x63e   :  { %v1560_v23 = vadd.f32 %v1509_v28, %v1465_v40  ;;  %v1562_v21 = vadd.f32 %v1552_v13, %v1467_v1  ;;  %v1511_v26 = vpop.f32.mrb[46].mxu0  ;;  %v1554_v29 = vpop.f32.mrb[62].mxu1 }
 0x63f   :  { %v2160_v27 = vmul.f32 -1.442695, %v1559_v60  ;;  %v1563_v31 = vadd.f32 %v1511_v26, %v1468_v2  ;;  %v1565_v35 = vadd.f32 %v1554_v29, %v1470_v20  ;;  %v1513_v62 = vpop.f32.mrb[47].mxu0  ;;  %v1556_v5 = vpop.f32.mrb[63].mxu1 }
 0x640   :  { %v2162_v32 = vmul.f32 -1.442695, %v1560_v23  ;;  %v1564_v11 = vadd.f32 %v1513_v62, %v1469_v30  ;;  %v1566_v33 = vadd.f32 %v1556_v5, %v1471_v24  ;;  %v2164_v49 = vmul.f32 -1.442695, %v1562_v21 }
 0x641   :  { %2452 = vpow2.f32 %v2160_v27  ;;  %v2161_v36 = vmul.f32 -1.442695, %v1563_v31 }
 0x642   :  { %2454 = vpow2.f32 %v2162_v32  ;;  %v2163_v3 = vmul.f32 -1.442695, %v1564_v11  ;;  %v2165_v38 = vmul.f32 -1.442695, %v1566_v33 }
 0x643   :  { %2456 = vpow2.f32 %v2161_v36 }
 0x644   :  { %2458 = vpow2.f32 %v2163_v3 }
 0x645   :  { %2460 = vtanh.f32 %v1561_v12 }
 0x646   :  { %2462 = vpow2.f32 %v2164_v49 }
 0x647   :  { %2464 = vtanh.f32 %v1565_v35 }
 0x64b   :  { %v2453_v47 = vpop.eup %2452 }
 0x64c   :  { %v2455_v37 = vpop.eup %2454  ;;  %v1573_v41 = vadd.f32 1.0, %v2453_v47 }
 0x64d   :  { %v1585_v39 = vadd.f32 1.0, %v2455_v37  ;;  %v2457_v40 = vpop.eup %2456 }
 0x64e   :  { %2466 = vrcp.f32 %v1573_v41  ;;  %v1574_v42 = vadd.f32 1.0, %v2457_v40  ;;  %v2459_v1 = vpop.eup %2458 }
 0x64f   :  { %2468 = vrcp.f32 %v1585_v39  ;;  %v1586_v60 = vadd.f32 1.0, %v2459_v1  ;;  %v2461_v28 = vpop.eup %2460 }
 0x650   :  { %2470 = vpow2.f32 %v2165_v38  ;;  %v2463_v13 = vpop.eup %2462 }
 0x651   :  { %2472 = vrcp.f32 %v1574_v42  ;;  %v2465_v2 = vpop.eup %2464  ;;  %v1599_v30 = vadd.f32 1.0, %v2463_v13 }
 0x652   :  { %2474 = vrcp.f32 %v1586_v60 }
 0x653   :  { %2476 = vrcp.f32 %v1599_v30 }
 0x658   :  { %v2467_v20 = vpop.eup %2466 }
 0x659   :  { %v2469_v12 = vpop.eup %2468  ;;  %v1607_v23 = vmul.f32 %v2467_v20, %v2461_v28 }
 0x65a   :  { %v2471_v21 = vpop.eup %2470  ;;  %v1605_v26 = vmul.f32 %v2469_v12, %v3431_v4 }
 0x65b   :  { %v2473_v29 = vpop.eup %2472  ;;  %v1600_v35 = vadd.f32 1.0, %v2471_v21 }
 0x65c   :  { %v3481_v24 = vadd.f32 %v1607_v23, %v1605_v26  ;;  %v1608_v27 = vmul.f32 %v2473_v29, %v2465_v2  ;;  %v2475_v31 = vpop.eup %2474 }
 0x65d   :  { %v1606_v62 = vmul.f32 %v2475_v31, %v3435_v51  ;;  %v2477_v32 = vpop.eup %2476 }
 0x65e   :  { %2478 = vtanh.f32 %v3481_v24 }
 0x65f   :  { %v3485_v5 = vadd.f32 %v1608_v27, %v1606_v62  ;;  %2480 = vrcp.f32 %v1600_v35 }
 0x661   :  { %2482 = vtanh.f32 %v3485_v5 }
 0x668   :  { %v2479_v11 = vpop.eup %2478 }
 0x669   :  { %v2481_v4 = vpop.eup %2480  ;;  %v1613_v36 = vmul.f32 %v2479_v11, %v2477_v32 }
 0x66b   :  { %v2483_v33 = vpop.eup %2482 }
 0x66c   :  { %v1614_v3 = vmul.f32 %v2483_v33, %v2481_v4 }
 0x66e   :  { %v1630_v49 = vpack.c.bf16 %v1614_v3, %v1613_v36 }
 0x670   :  { %1664 = vmatmul.mubr.bf16.vlgmr.msra.gmra.mrb[48].mxu0 %v1630_v49  ;;  %1707 = vmatmul.mubr.bf16.vlgmr.msra.gmra.mrb[64].mxu1 %v1630_v49 }
 0x671   :  { %1790 = vmatpush1.bf16.msra.mxu0 %v3131_v54  ;;  %1833 = vmatpush1.bf16.msra.mxu1 %v3222_v55 }
 0x672   :  { %1791 = vmatprep.subr.bf16.mxu0 %v3138_v14  ;;  %1834 = vmatprep.subr.bf16.mxu1 %v3229_v43  ;;  %v3642_v14 = vld [vmem:[#allocation21_spill] sm:$0xff]  ;;  %v3644_v43 = vld [vmem:[#allocation22_spill] sm:$0xff] }
 0x673   :  { %1821 = vmatprep.mubr.bf16.mxu0 %v3628_v53  ;;  %1864 = vmatprep.mubr.bf16.mxu1 %v3628_v53  ;;  %v3641_v53 = vld [vmem:[#allocation5_spill] sm:$0xff] }
 0x674   :  { %v1622_v54 = vunpack.c.l.bf16 %v3641_v53 }
 0x675   :  { %1792 = vmatpush1.bf16.msra.mxu0 %v3147_v15  ;;  %1835 = vmatpush1.bf16.msra.mxu1 %v3238_v44  ;;  %v1624_v15 = vunpack.c.l.bf16 %v3642_v14  ;;  %v1625_v44 = vunpack.c.l.bf16 %v3644_v43 }
 0x676   :  { %1793 = vmatprep.subr.bf16.mxu0 %v3154_v18  ;;  %1836 = vmatprep.subr.bf16.mxu1 %v3245_v16 }
 0x679   :  { %1794 = vmatpush1.bf16.msra.mxu0 %v3161_v19  ;;  %1837 = vmatpush1.bf16.msra.mxu1 %v3252_v46 }
 0x67a   :  { %1795 = vmatprep.subr.bf16.mxu0 %v3168_v22  ;;  %1838 = vmatprep.subr.bf16.mxu1 %v3259_v61  ;;  %v3643_v22 = vld [vmem:[#allocation6_spill] sm:$0xff] }
 0x67b   :  { %v1623_v55 = vunpack.c.l.bf16 %v3643_v22 }
 0x67d   :  { %1796 = vmatpush1.bf16.msra.mxu0 %v3265_v57  ;;  %1839 = vmatpush1.bf16.msra.mxu1 %v3271_v17  ;;  %v1626_v17 = vunpack.c.h.bf16 %v3641_v53 }
 0x67e   :  { %1797 = vmatprep.subr.bf16.mxu0 %v3277_v50  ;;  %1840 = vmatprep.subr.bf16.mxu1 %v3283_v8  ;;  %v1628_v50 = vunpack.c.h.bf16 %v3642_v14  ;;  %v2582_v14 = vmov 0.0  }
 0x681   :  { %1798 = vmatpush1.bf16.msra.mxu0 %v3289_v63  ;;  %1841 = vmatpush1.bf16.msra.mxu1 %v3295_v9 }
 0x682   :  { %1799 = vmatprep.subr.bf16.mxu0 %v3301_v7  ;;  %1842 = vmatprep.subr.bf16.mxu1 %v3307_v0  ;;  %v1627_v0 = vunpack.c.h.bf16 %v3643_v22  ;;  %v2288_v22 = vld [vmem:[%s3583_s4 + $0x20] sm:$0xff]  }
 0x685   :  { %1800 = vmatpush1.bf16.msra.mxu0 %v3313_v59  ;;  %1843 = vmatpush1.bf16.msra.mxu1 %v3319_v6  ;;  %v1629_v59 = vunpack.c.h.bf16 %v3644_v43  ;;  %v2290_v43 = vld [vmem:[%s3583_s4 + $0x30] sm:$0xff]  }
 0x686   :  { %1801 = vmatprep.subr.bf16.mxu0 %v3325_v34  ;;  %1844 = vmatprep.subr.bf16.mxu1 %v3331_v48 }
 0x689   :  { %1802 = vmatpush1.bf16.msra.mxu0 %v3337_v52  ;;  %1845 = vmatpush1.bf16.msra.mxu1 %v3343_v25 }
 0x68a   :  { %1803 = vmatprep.subr.bf16.mxu0 %v3349_v45  ;;  %1846 = vmatprep.subr.bf16.mxu1 %v3355_v58 }
 0x68d   :  { %1804 = vmatpush1.bf16.msra.mxu0 %v3361_v56  ;;  %1847 = vmatpush1.bf16.msra.mxu1 %v3367_v10 }
 0x68e   :  { %2196 = vmatprep.subr.bf16.mxu0 %v2582_v14 }
 0x743   :  { %v1665_v18 = vpop.f32.mrb[48].mxu0  ;;  %v1708_v19 = vpop.f32.mrb[64].mxu1 }
 0x744   :  { %v1717_v16 = vadd.f32 %v1665_v18, %v1622_v54  ;;  %v1719_v46 = vadd.f32 %v1708_v19, %v1624_v15  ;;  %v1667_v61 = vpop.f32.mrb[49].mxu0  ;;  %v1710_v57 = vpop.f32.mrb[65].mxu1  ;;  %v2285_v15 = vld [vmem:[%s3583_s4 + $0x8] sm:$0xff]   ;;  %v2286_v18 = vld [vmem:[%s3583_s4 + $0x10] sm:$0xff]   ;;  %v2287_v19 = vld [vmem:[%s3583_s4 + $0x18] sm:$0xff]  }
 0x745   :  { %v1718_v8 = vadd.f32 %v1667_v61, %v1623_v55  ;;  %v1720_v63 = vadd.f32 %v1710_v57, %v1625_v44  ;;  %v1669_v9 = vpop.f32.mrb[50].mxu0  ;;  %v1712_v7 = vpop.f32.mrb[66].mxu1  ;;  %v2289_v55 = vld [vmem:[%s3583_s4 + $0x28] sm:$0xff]   ;;  %v2291_v44 = vld [vmem:[%s3583_s4 + $0x38] sm:$0xff]   ;;  %v3646_v61 = vld [vmem:[#allocation23_spill] sm:$0xff] }
 0x746   :  { %v2166_v6 = vmul.f32 -1.442695, %v1717_v16  ;;  %v1721_v34 = vadd.f32 %v1669_v9, %v1626_v17  ;;  %v1723_v48 = vadd.f32 %v1712_v7, %v1628_v50  ;;  %v1671_v52 = vpop.f32.mrb[51].mxu0  ;;  %v1714_v25 = vpop.f32.mrb[67].mxu1  ;;  %v3645_v16 = vld [vmem:[#allocation7_spill] sm:$0xff]  ;;  %v1782_v57 = vunpack.c.l.bf16 %v3646_v61  ;;  %v3648_v9 = vld [vmem:[#allocation24_spill] sm:$0xff] }
 0x747   :  { %v2168_v45 = vmul.f32 -1.442695, %v1718_v8  ;;  %v1722_v58 = vadd.f32 %v1671_v52, %v1627_v0  ;;  %v1724_v56 = vadd.f32 %v1714_v25, %v1629_v59  ;;  %v2170_v47 = vmul.f32 -1.442695, %v1720_v63  ;;  %v3647_v8 = vld [vmem:[#allocation8_spill] sm:$0xff] }
 0x748   :  { %2484 = vpow2.f32 %v2166_v6  ;;  %v2167_v10 = vmul.f32 -1.442695, %v1721_v34  ;;  %v1781_v63 = vunpack.c.l.bf16 %v3647_v8  ;;  %v1783_v7 = vunpack.c.l.bf16 %v3648_v9 }
 0x749   :  { %2486 = vpow2.f32 %v2168_v45  ;;  %v2169_v51 = vmul.f32 -1.442695, %v1722_v58  ;;  %v2171_v39 = vmul.f32 -1.442695, %v1724_v56  ;;  %v1786_v52 = vunpack.c.h.bf16 %v3646_v61 }
 0x74a   :  { %2488 = vpow2.f32 %v2167_v10  ;;  %v1785_v10 = vunpack.c.h.bf16 %v3647_v8 }
 0x74b   :  { %2490 = vpow2.f32 %v2169_v51  ;;  %v1787_v51 = vunpack.c.h.bf16 %v3648_v9 }
 0x74c   :  { %2492 = vtanh.f32 %v1719_v46  ;;  %v1780_v46 = vunpack.c.l.bf16 %v3645_v16 }
 0x74d   :  { %2494 = vpow2.f32 %v2170_v47 }
 0x74e   :  { %2496 = vtanh.f32 %v1723_v48  ;;  %v1784_v48 = vunpack.c.h.bf16 %v3645_v16 }
 0x752   :  { %v2485_v37 = vpop.eup %2484 }
 0x753   :  { %v2487_v41 = vpop.eup %2486  ;;  %v1731_v38 = vadd.f32 1.0, %v2485_v37 }
 0x754   :  { %v1743_v40 = vadd.f32 1.0, %v2487_v41  ;;  %v2489_v42 = vpop.eup %2488 }
 0x755   :  { %2498 = vrcp.f32 %v1731_v38  ;;  %v1732_v1 = vadd.f32 1.0, %v2489_v42  ;;  %v2491_v60 = vpop.eup %2490 }
 0x756   :  { %2500 = vrcp.f32 %v1743_v40  ;;  %v1744_v28 = vadd.f32 1.0, %v2491_v60  ;;  %v2493_v13 = vpop.eup %2492 }
 0x757   :  { %2502 = vpow2.f32 %v2171_v39  ;;  %v2495_v2 = vpop.eup %2494 }
 0x758   :  { %2504 = vrcp.f32 %v1732_v1  ;;  %v2497_v20 = vpop.eup %2496  ;;  %v1757_v27 = vadd.f32 1.0, %v2495_v2 }
 0x759   :  { %2506 = vrcp.f32 %v1744_v28 }
 0x75a   :  { %2508 = vrcp.f32 %v1757_v27 }
 0x75f   :  { %v2499_v12 = vpop.eup %2498 }
 0x760   :  { %v2501_v23 = vpop.eup %2500  ;;  %v1765_v21 = vmul.f32 %v2499_v12, %v2493_v13 }
 0x761   :  { %v2503_v26 = vpop.eup %2502  ;;  %v1763_v29 = vmul.f32 %v2501_v23, %v3481_v24 }
 0x762   :  { %v2505_v30 = vpop.eup %2504  ;;  %v1758_v32 = vadd.f32 1.0, %v2503_v26 }
 0x763   :  { %v3529_v31 = vadd.f32 %v1765_v21, %v1763_v29  ;;  %v1766_v35 = vmul.f32 %v2505_v30, %v2497_v20  ;;  %v2507_v62 = vpop.eup %2506 }
 0x764   :  { %v1764_v11 = vmul.f32 %v2507_v62, %v3485_v5  ;;  %v2509_v33 = vpop.eup %2508  ;;  %v2284_v5 = vld [vmem:[%s3583_s4] sm:$0xff]  }
 0x765   :  { %2510 = vtanh.f32 %v3529_v31 }
 0x766   :  { %v3533_v4 = vadd.f32 %v1766_v35, %v1764_v11  ;;  %2512 = vrcp.f32 %v1758_v32 }
 0x768   :  { %2514 = vtanh.f32 %v3533_v4 }
 0x76f   :  { %v2511_v36 = vpop.eup %2510 }
 0x770   :  { %v2513_v24 = vpop.eup %2512  ;;  %v1771_v49 = vmul.f32 %v2511_v36, %v2509_v33 }
 0x772   :  { %v2515_v3 = vpop.eup %2514 }
 0x773   :  { %v1772_v53 = vmul.f32 %v2515_v3, %v2513_v24 }
 0x775   :  { %v1788_v54 = vpack.c.bf16 %v1772_v53, %v1771_v49 }
 0x777   :  { %1822 = vmatmul.mubr.bf16.vlgmr.msra.gmra.mrb[52].mxu0 %v1788_v54  ;;  %1865 = vmatmul.mubr.bf16.vlgmr.msra.gmra.mrb[68].mxu1 %v1788_v54 }
 0x778   :  { %2197 = vmatpush3.bf16.msra.mxu0 %v2284_v5  ;;  %2212 = vmatprep.mubr.msk.bf16.mxu0 %vm2583_vm1, %v2582_v14 }
 0x779   :  { %2198 = vmatprep.subr.bf16.mxu0 %v2582_v14 }
 0x77c   :  { %2199 = vmatpush3.bf16.msra.mxu0 %v2285_v15 }
 0x77d   :  { %2200 = vmatprep.subr.bf16.mxu0 %v2582_v14 }
 0x780   :  { %2201 = vmatpush3.bf16.msra.mxu0 %v2286_v18 }
 0x781   :  { %2202 = vmatprep.subr.bf16.mxu0 %v2582_v14 }
 0x784   :  { %2203 = vmatpush3.bf16.msra.mxu0 %v2287_v19 }
 0x785   :  { %2204 = vmatprep.subr.bf16.mxu0 %v2582_v14 }
 0x788   :  { %2205 = vmatpush3.bf16.msra.mxu0 %v2288_v22 }
 0x789   :  { %2206 = vmatprep.subr.bf16.mxu0 %v2582_v14 }
 0x78c   :  { %2207 = vmatpush3.bf16.msra.mxu0 %v2289_v55 }
 0x78d   :  { %2208 = vmatprep.subr.bf16.mxu0 %v2582_v14 }
 0x790   :  { %2209 = vmatpush3.bf16.msra.mxu0 %v2290_v43 }
 0x791   :  { %2210 = vmatprep.subr.bf16.mxu0 %v2582_v14 }
 0x794   :  { %2211 = vmatpush3.bf16.msra.mxu0 %v2291_v44 }
 0x84a   :  { %v1823_v17 = vpop.f32.mrb[52].mxu0  ;;  %v1866_v50 = vpop.f32.mrb[68].mxu1 }
 0x84b   :  { %v1875_v0 = vadd.f32 %v1823_v17, %v1780_v46  ;;  %v1877_v59 = vadd.f32 %v1866_v50, %v1782_v57  ;;  %v1825_v6 = vpop.f32.mrb[53].mxu0  ;;  %v1868_v34 = vpop.f32.mrb[69].mxu1 }
 0x84c   :  { %v1876_v25 = vadd.f32 %v1825_v6, %v1781_v63  ;;  %v1878_v45 = vadd.f32 %v1868_v34, %v1783_v7  ;;  %v1827_v58 = vpop.f32.mrb[54].mxu0  ;;  %v1870_v56 = vpop.f32.mrb[70].mxu1 }
 0x84d   :  { %v2172_v47 = vmul.f32 -1.442695, %v1875_v0  ;;  %v1879_v37 = vadd.f32 %v1827_v58, %v1784_v48  ;;  %v1881_v41 = vadd.f32 %v1870_v56, %v1786_v52  ;;  %v1829_v38 = vpop.f32.mrb[55].mxu0  ;;  %v1872_v39 = vpop.f32.mrb[71].mxu1 }
 0x84e   :  { %v2174_v40 = vmul.f32 -1.442695, %v1876_v25  ;;  %v1880_v42 = vadd.f32 %v1829_v38, %v1785_v10  ;;  %v1882_v1 = vadd.f32 %v1872_v39, %v1787_v51  ;;  %v2176_v13 = vmul.f32 -1.442695, %v1878_v45 }
 0x84f   :  { %2516 = vpow2.f32 %v2172_v47  ;;  %v2173_v60 = vmul.f32 -1.442695, %v1879_v37 }
 0x850   :  { %2518 = vpow2.f32 %v2174_v40  ;;  %v2175_v28 = vmul.f32 -1.442695, %v1880_v42  ;;  %v2177_v23 = vmul.f32 -1.442695, %v1882_v1 }
 0x851   :  { %2520 = vpow2.f32 %v2173_v60 }
 0x852   :  { %2522 = vpow2.f32 %v2175_v28 }
 0x853   :  { %2524 = vtanh.f32 %v1877_v59 }
 0x854   :  { %2526 = vpow2.f32 %v2176_v13 }
 0x855   :  { %2528 = vtanh.f32 %v1881_v41 }
 0x859   :  { %v2517_v2 = vpop.eup %2516 }
 0x85a   :  { %v2519_v20 = vpop.eup %2518  ;;  %v1889_v12 = vadd.f32 1.0, %v2517_v2 }
 0x85b   :  { %v1901_v21 = vadd.f32 1.0, %v2519_v20  ;;  %v2521_v26 = vpop.eup %2520 }
 0x85c   :  { %2530 = vrcp.f32 %v1889_v12  ;;  %v1890_v29 = vadd.f32 1.0, %v2521_v26  ;;  %v2523_v30 = vpop.eup %2522 }
 0x85d   :  { %2532 = vrcp.f32 %v1901_v21  ;;  %v1902_v27 = vadd.f32 1.0, %v2523_v30  ;;  %v2525_v35 = vpop.eup %2524 }
 0x85e   :  { %2534 = vpow2.f32 %v2177_v23  ;;  %v2527_v62 = vpop.eup %2526 }
 0x85f   :  { %2536 = vrcp.f32 %v1890_v29  ;;  %v2529_v32 = vpop.eup %2528  ;;  %v1915_v24 = vadd.f32 1.0, %v2527_v62 }
 0x860   :  { %2538 = vrcp.f32 %v1902_v27 }
 0x861   :  { %2540 = vrcp.f32 %v1915_v24 }
 0x866   :  { %v2531_v11 = vpop.eup %2530 }
 0x867   :  { %v2533_v33 = vpop.eup %2532  ;;  %v1923_v36 = vmul.f32 %v2531_v11, %v2525_v35 }
 0x868   :  { %v2535_v3 = vpop.eup %2534  ;;  %v1921_v49 = vmul.f32 %v2533_v33, %v3529_v31  ;;  %v2178_v31 = vld [vmem:[%s3584_s5] ss:$0 sm:$0xff] }
 0x869   :  { %v2537_v53 = vpop.eup %2536  ;;  %v1916_v15 = vadd.f32 1.0, %v2535_v3 }
 0x86a   :  { %v1925_v54 = vadd.f32 %v1923_v36, %v1921_v49  ;;  %v1924_v5 = vmul.f32 %v2537_v53, %v2529_v32  ;;  %v2539_v14 = vpop.eup %2538 }
 0x86b   :  { %v1922_v18 = vmul.f32 %v2539_v14, %v3533_v4  ;;  %v2541_v22 = vpop.eup %2540 }
 0x86c   :  { %2542 = vtanh.f32 %v1925_v54 }
 0x86d   :  { %v1926_v19 = vadd.f32 %v1924_v5, %v1922_v18  ;;  %2544 = vrcp.f32 %v1916_v15 }
 0x86f   :  { %2546 = vtanh.f32 %v1926_v19 }
 0x876   :  { %v2543_v55 = vpop.eup %2542 }
 0x877   :  { %v1929_v43 = vmul.f32 %v2543_v55, %v2541_v22  ;;  %v2545_v44 = vpop.eup %2544 }
 0x879   :  { %v2547_v16 = vpop.eup %2546 }
 0x87a   :  { %v1930_v46 = vmul.f32 %v2547_v16, %v2545_v44 }
 0x87c   :  { %v1938_v61 = vpack.c.bf16 %v1930_v46, %v1929_v43 }
 0x87e   :  { %2213 = vmatmul.mubr.bf16.vlgmr.msra.gmra.mrb[56].mxu0 %v1938_v61 }
 0x951   :  { %v2044_v57 = vpop.f32.mrb[56].mxu0 }
 0x952   :  { %v2045_v17 = vadd.f32 %v2178_v31, %v2044_v57  ;;  %v2214_v50 = vpop.f32.mrb[57].mxu0 }
 0x953   :  { %v2047_v8 = vpop.f32.mrb[58].mxu0 }
 0x954   :  { %2051 = vst [vmem:[%s3585_s6] sm:$0xff] %v2045_v17  ;;  %v2048_v4 = vadd.f32 %v2178_v31, %v2047_v8  ;;  %v2215_v63 = vpop.f32.mrb[59].mxu0 }
 0x956   :  { %2052 = vst [vmem:[%s3585_s6 + $0x8] sm:$0xff] %v2048_v4 }

</bundles_post_ra>
